<compile_context>
chip_gen: v6e
topology: v6e:2x2x1
jax: 0.10.0
libtpu: 0.0.40
codegen_flags: <defaults>
</compile_context>

<pallas_src>
import math

import jax
import jax.numpy as jnp
from jax import lax
from jax.experimental import pallas as pl
from jax.experimental.pallas import tpu as pltpu

INPUT_DIM = 32
SEQ = 8
BATCH = 2
EMBED = 128
NUM_HEADS = 4
HEAD_DIM = EMBED // NUM_HEADS  # 32
LN_EPS = 1e-5
MAX_TILE_ROWS = 256            # per-grid-step row tile (multiple of SEQ)

# ---- packed-bias layout (all slot starts are multiples of 128 lanes) ----
_B1_OFF = 0        # (1, 512)
_B2_OFF = 512      # (1, 256)
_B3_OFF = 768      # (1, 128)
_BQKV_OFF = 896    # (1, 384)  q|k|v
_BO_OFF = 1280     # (1, 128)
_GAMMA_OFF = 1408  # (1, 128)
_BETA_OFF = 1536   # (1, 128)
_B4_OFF = 1664     # (1, 256)
_B5_OFF = 1920     # (1, 512)
_B6_OFF = 2432     # (1, 32)  (slot padded to 128)
_BS_OFF = 2560     # (1, 32)  (slot padded to 128)
_BIAS_TOTAL = 2688


def _layer_norm(y, gamma, beta):
    mean = jnp.mean(y, axis=-1, keepdims=True)
    var = jnp.mean((y - mean) ** 2, axis=-1, keepdims=True)  # biased, like PyTorch
    inv = lax.rsqrt(var + LN_EPS)
    return (y - mean) * inv * gamma + beta


def soh2_kernel(
    x_ref,
    w1ws_ref,                    # (D, 512+D)  encoder L1 fused with skip
    w2_ref, w3_ref,              # encoder L2 / L3
    wqkv_ref,                    # (EMBED, 3*EMBED) fused attention in-proj
    wo_ref,                      # attention out-proj
    w4_ref, w5_ref, w6_ref,      # decoder
    bias_ref,                    # (1, _BIAS_TOTAL) packed f32 biases/gamma/beta
    o_ref,
):
    tile = x_ref.shape[0]        # static (block shape)
    ns = tile // SEQ             # sequences per row tile

    def bias(off, n):
        return bias_ref[:, off:off + n]          # (1, n) f32, static slice

    x = x_ref[...]                               # (tile, D) f32
    xb = x.astype(jnp.bfloat16)

    # ---- encoder L1 fused with skip projection: x @ [w1 | ws] -> (tile, 544)
    h0 = jnp.dot(xb, w1ws_ref[...], preferred_element_type=jnp.float32)
    h1 = jnp.maximum(h0[:, :512] + bias(_B1_OFF, 512), 0.0)          # ReLU
    skip = h0[:, 512:512 + INPUT_DIM] + bias(_BS_OFF, INPUT_DIM)     # skip(x)
    # Dropout(0.2) -> identity in eval mode.

    h2 = jnp.maximum(
        jnp.dot(h1.astype(jnp.bfloat16), w2_ref[...],
                preferred_element_type=jnp.float32) + bias(_B2_OFF, 256), 0.0)
    enc = jnp.dot(h2.astype(jnp.bfloat16), w3_ref[...],
                  preferred_element_type=jnp.float32) + bias(_B3_OFF, EMBED)

    # ---- multi-head self-attention (eval mode, attn dropout = identity)
    qkv = jnp.dot(enc.astype(jnp.bfloat16), wqkv_ref[...],
                  preferred_element_type=jnp.float32) + bias(_BQKV_OFF, 3 * EMBED)
    q = qkv[:, :EMBED].reshape(ns, SEQ, EMBED)
    k = qkv[:, EMBED:2 * EMBED].reshape(ns, SEQ, EMBED)
    v = qkv[:, 2 * EMBED:3 * EMBED].reshape(ns, SEQ, EMBED)

    scale = 1.0 / math.sqrt(HEAD_DIM)
    head_outs = []
    for hh in range(NUM_HEADS):                  # static 4-head loop, batched over ns
        cs = slice(hh * HEAD_DIM, (hh + 1) * HEAD_DIM)
        qh = q[:, :, cs].astype(jnp.bfloat16)    # (ns, S, HD)
        kh = k[:, :, cs].astype(jnp.bfloat16)
        vh = v[:, :, cs].astype(jnp.bfloat16)
        s = jnp.einsum('bqd,bkd->bqk', qh, kh,
                       preferred_element_type=jnp.float32) * scale    # (ns, S, S)
        s = s - jnp.max(s, axis=-1, keepdims=True)
        p = jnp.exp(s)
        p = p / jnp.sum(p, axis=-1, keepdims=True)   # exact softmax normalization
        head_outs.append(
            jnp.einsum('bqk,bkd->bqd', p.astype(jnp.bfloat16), vh,
                       preferred_element_type=jnp.float32))           # (ns, S, HD)
    attn = jnp.concatenate(head_outs, axis=-1).reshape(tile, EMBED)   # register value
    attn = jnp.dot(attn.astype(jnp.bfloat16), wo_ref[...],
                   preferred_element_type=jnp.float32) + bias(_BO_OFF, EMBED)

    # ---- residual + LayerNorm
    y = _layer_norm(enc + attn, bias(_GAMMA_OFF, EMBED), bias(_BETA_OFF, EMBED))

    # ---- decoder: Linear -> ReLU -> Linear -> ReLU -> Linear
    d = jnp.maximum(
        jnp.dot(y.astype(jnp.bfloat16), w4_ref[...],
                preferred_element_type=jnp.float32) + bias(_B4_OFF, 256), 0.0)
    d = jnp.maximum(
        jnp.dot(d.astype(jnp.bfloat16), w5_ref[...],
                preferred_element_type=jnp.float32) + bias(_B5_OFF, 512), 0.0)
    dec = jnp.dot(d.astype(jnp.bfloat16), w6_ref[...],
                  preferred_element_type=jnp.float32) + bias(_B6_OFF, INPUT_DIM)

    o_ref[...] = dec + skip


@jax.jit
def soh_predictor2(x, params):
    """x: (B, S, D) float32; params: tuple from prepare_kernel_params."""
    B, S, D = x.shape
    assert S == SEQ and D == INPUT_DIM
    rows = B * S
    x2 = x.reshape(rows, D)

    tile = min(rows, MAX_TILE_ROWS)              # multiple of SEQ by construction
    n_tiles = pl.cdiv(rows, tile)
    padded = n_tiles * tile
    if padded != rows:
        x2 = jnp.pad(x2, ((0, padded - rows), (0, 0)))

    (w1ws, w2, w3, wqkv, wo, w4, w5, w6, biases) = params
    const = lambda a: pl.BlockSpec(a.shape, lambda i: (0, 0))  # weight stays VMEM-resident

    out2 = pl.pallas_call(
        soh2_kernel,
        out_shape=jax.ShapeDtypeStruct((padded, D), jnp.float32),
        grid=(n_tiles,),
        in_specs=[
            pl.BlockSpec((tile, D), lambda i: (i, 0)),     # x rows: pipelined over grid
            const(w1ws), const(w2), const(w3),
            const(wqkv), const(wo),
            const(w4), const(w5), const(w6),
            const(biases),
        ],
        out_specs=pl.BlockSpec((tile, D), lambda i: (i, 0)),
        compiler_params=pltpu.CompilerParams(
            dimension_semantics=("parallel",)),            # both TCs on v7x
        cost_estimate=pl.CostEstimate(
            flops=int(padded) * 870_000,                   # ~0.87 MFLOP / row
            transcendentals=int(padded) * 40,              # exp (H*S/row) + rsqrt
            bytes_accessed=900_000 + int(padded) * 256,    # bf16 weights + x/out rows
        ),
    )(x2, w1ws, w2, w3, wqkv, wo, w4, w5, w6, biases)
    return out2[:rows].reshape(B, S, D)


def init_params(key, input_dim):
    """Deterministic synthetic weights; Linear weights stored as (in, out), float32."""
    shapes = {
        "w1": (input_dim, 512), "b1": (1, 512),
        "w2": (512, 256), "b2": (1, 256),
        "w3": (256, EMBED), "b3": (1, EMBED),
        "wq": (EMBED, EMBED), "bq": (1, EMBED),
        "wk": (EMBED, EMBED), "bk": (1, EMBED),
        "wv": (EMBED, EMBED), "bv": (1, EMBED),
        "wo": (EMBED, EMBED), "bo": (1, EMBED),
        "gamma": (1, EMBED), "beta": (1, EMBED),
        "w4": (EMBED, 256), "b4": (1, 256),
        "w5": (256, 512), "b5": (1, 512),
        "w6": (512, input_dim), "b6": (1, input_dim),
        "ws": (input_dim, input_dim), "bs": (1, input_dim),
    }
    keys = jax.random.split(key, len(shapes))
    params = {}
    for (name, shape), k in zip(shapes.items(), keys):
        if name == "gamma":
            params[name] = jnp.ones(shape, jnp.float32)
        elif name == "beta":
            params[name] = jnp.zeros(shape, jnp.float32)
        elif name.startswith("b"):
            params[name] = 0.01 * jax.random.normal(k, shape, jnp.float32)
        else:
            fan_in = shape[0]
            params[name] = jax.random.normal(k, shape, jnp.float32) / math.sqrt(fan_in)
    return params


def prepare_kernel_params(p):
    """Fuse w1+skip and Q/K/V weights, pack all biases, cast weights to bf16.

    Biases / gamma / beta stay float32; all matmuls accumulate in f32.
    """
    bf = lambda w: w.astype(jnp.bfloat16)
    w1ws = jnp.concatenate([p["w1"], p["ws"]], axis=1)            # (32, 544)
    wqkv = jnp.concatenate([p["wq"], p["wk"], p["wv"]], axis=1)   # (128, 384)
    pad96 = jnp.zeros((1, 96), jnp.float32)
    biases = jnp.concatenate(
        [p["b1"], p["b2"], p["b3"],
         p["bq"], p["bk"], p["bv"], p["bo"],
         p["gamma"], p["beta"],
         p["b4"], p["b5"],
         p["b6"], pad96, p["bs"], pad96], axis=1)                 # (1, 2688)
    assert biases.shape == (1, _BIAS_TOTAL), biases.shape
    return (bf(w1ws), bf(p["w2"]), bf(p["w3"]), bf(wqkv), bf(p["wo"]),
            bf(p["w4"]), bf(p["w5"]), bf(p["w6"]), biases)


if __name__ == "__main__":
    key = jax.random.PRNGKey(0)
    kx, kp = jax.random.split(key)
    x = jax.random.normal(kx, (BATCH, SEQ, INPUT_DIM), jnp.float32)
    params = prepare_kernel_params(init_params(kp, INPUT_DIM))

    out = soh_predictor2(x, params)
    jax.block_until_ready(out)
    assert out.shape == (BATCH, SEQ, INPUT_DIM), out.shape
    assert bool(jnp.all(jnp.isfinite(out)))
    print("KERNEL_OK")
</pallas_src>

<mosaic_0001>
module attributes {stable_mosaic.version = 11 : i64} {
  func.func @soh2_kernel(%arg0: i32, %arg1: memref<16x32xf32, #tpu.memory_space<vmem>>, %arg2: memref<32x544xbf16, #tpu.memory_space<vmem>>, %arg3: memref<512x256xbf16, #tpu.memory_space<vmem>>, %arg4: memref<256x128xbf16, #tpu.memory_space<vmem>>, %arg5: memref<128x384xbf16, #tpu.memory_space<vmem>>, %arg6: memref<128x128xbf16, #tpu.memory_space<vmem>>, %arg7: memref<128x256xbf16, #tpu.memory_space<vmem>>, %arg8: memref<256x512xbf16, #tpu.memory_space<vmem>>, %arg9: memref<512x32xbf16, #tpu.memory_space<vmem>>, %arg10: memref<1x2688xf32, #tpu.memory_space<vmem>>, %arg11: memref<16x32xf32, #tpu.memory_space<vmem>>) attributes {dimension_semantics = [#tpu.dimension_semantics<parallel>], iteration_bounds = array<i64: 1>, scalar_prefetch = 0 : i64, scratch_operands = 0 : i64, tpu.core_type = #tpu.core_type<tc>, window_params = [{transform_indices = @transform_0, window_bounds = array<i64: 16, 32>}, {pipeline_mode = #tpu.pipeline_mode<synchronous>, transform_indices = @transform_1, window_bounds = array<i64: 32, 544>}, {pipeline_mode = #tpu.pipeline_mode<synchronous>, transform_indices = @transform_2, window_bounds = array<i64: 512, 256>}, {pipeline_mode = #tpu.pipeline_mode<synchronous>, transform_indices = @transform_3, window_bounds = array<i64: 256, 128>}, {pipeline_mode = #tpu.pipeline_mode<synchronous>, transform_indices = @transform_4, window_bounds = array<i64: 128, 384>}, {pipeline_mode = #tpu.pipeline_mode<synchronous>, transform_indices = @transform_5, window_bounds = array<i64: 128, 128>}, {pipeline_mode = #tpu.pipeline_mode<synchronous>, transform_indices = @transform_6, window_bounds = array<i64: 128, 256>}, {pipeline_mode = #tpu.pipeline_mode<synchronous>, transform_indices = @transform_7, window_bounds = array<i64: 256, 512>}, {pipeline_mode = #tpu.pipeline_mode<synchronous>, transform_indices = @transform_8, window_bounds = array<i64: 512, 32>}, {pipeline_mode = #tpu.pipeline_mode<synchronous>, transform_indices = @transform_9, window_bounds = array<i64: 1, 2688>}, {transform_indices = @transform_10, window_bounds = array<i64: 16, 32>}]} {
    %c0 = arith.constant 0 : index
    %c0_0 = arith.constant 0 : index
    %0 = vector.load %arg1[%c0, %c0_0] : memref<16x32xf32, #tpu.memory_space<vmem>>, vector<16x32xf32>
    %1 = arith.truncf %0 : vector<16x32xf32> to vector<16x32xbf16>
    %c0_1 = arith.constant 0 : index
    %c0_2 = arith.constant 0 : index
    %2 = vector.load %arg2[%c0_1, %c0_2] : memref<32x544xbf16, #tpu.memory_space<vmem>>, vector<32x544xbf16>
    %cst = arith.constant dense<0.000000e+00> : vector<16x544xf32>
    %3 = tpu.matmul %1, %2, %cst {dimension_numbers = #tpu.dot_dimension_numbers<[1], [0], [0], [1], [0, 0, 1, 1], [], []>} : vector<16x32xbf16>, vector<32x544xbf16>, vector<16x544xf32> -> vector<16x544xf32>
    %4 = vector.extract_strided_slice %3 {offsets = [0, 0], sizes = [16, 512], strides = [1, 1]} : vector<16x544xf32> to vector<16x512xf32>
    %c0_3 = arith.constant 0 : index
    %c0_4 = arith.constant 0 : index
    %5 = vector.load %arg10[%c0_3, %c0_4] : memref<1x2688xf32, #tpu.memory_space<vmem>>, vector<1x512xf32>
    %6 = vector.broadcast %5 : vector<1x512xf32> to vector<16x512xf32>
    %7 = arith.addf %4, %6 : vector<16x512xf32>
    %cst_5 = arith.constant 0.000000e+00 : f32
    %8 = vector.broadcast %cst_5 : f32 to vector<16x512xf32>
    %9 = arith.maximumf %7, %8 : vector<16x512xf32>
    %10 = vector.extract_strided_slice %3 {offsets = [0, 512], sizes = [16, 32], strides = [1, 1]} : vector<16x544xf32> to vector<16x32xf32>
    %c0_6 = arith.constant 0 : index
    %c2560 = arith.constant 2560 : index
    %11 = vector.load %arg10[%c0_6, %c2560] : memref<1x2688xf32, #tpu.memory_space<vmem>>, vector<1x32xf32>
    %12 = vector.broadcast %11 : vector<1x32xf32> to vector<16x32xf32>
    %13 = arith.addf %10, %12 : vector<16x32xf32>
    %14 = arith.truncf %9 : vector<16x512xf32> to vector<16x512xbf16>
    %c0_7 = arith.constant 0 : index
    %c0_8 = arith.constant 0 : index
    %15 = vector.load %arg3[%c0_7, %c0_8] : memref<512x256xbf16, #tpu.memory_space<vmem>>, vector<512x256xbf16>
    %cst_9 = arith.constant dense<0.000000e+00> : vector<16x256xf32>
    %16 = tpu.matmul %14, %15, %cst_9 {dimension_numbers = #tpu.dot_dimension_numbers<[1], [0], [0], [1], [0, 0, 1, 1], [], []>} : vector<16x512xbf16>, vector<512x256xbf16>, vector<16x256xf32> -> vector<16x256xf32>
    %c0_10 = arith.constant 0 : index
    %c512 = arith.constant 512 : index
    %17 = vector.load %arg10[%c0_10, %c512] : memref<1x2688xf32, #tpu.memory_space<vmem>>, vector<1x256xf32>
    %18 = vector.broadcast %17 : vector<1x256xf32> to vector<16x256xf32>
    %19 = arith.addf %16, %18 : vector<16x256xf32>
    %cst_11 = arith.constant 0.000000e+00 : f32
    %20 = vector.broadcast %cst_11 : f32 to vector<16x256xf32>
    %21 = arith.maximumf %19, %20 : vector<16x256xf32>
    %22 = arith.truncf %21 : vector<16x256xf32> to vector<16x256xbf16>
    %c0_12 = arith.constant 0 : index
    %c0_13 = arith.constant 0 : index
    %23 = vector.load %arg4[%c0_12, %c0_13] : memref<256x128xbf16, #tpu.memory_space<vmem>>, vector<256x128xbf16>
    %cst_14 = arith.constant dense<0.000000e+00> : vector<16x128xf32>
    %24 = tpu.matmul %22, %23, %cst_14 {dimension_numbers = #tpu.dot_dimension_numbers<[1], [0], [0], [1], [0, 0, 1, 1], [], []>} : vector<16x256xbf16>, vector<256x128xbf16>, vector<16x128xf32> -> vector<16x128xf32>
    %c0_15 = arith.constant 0 : index
    %c768 = arith.constant 768 : index
    %25 = vector.load %arg10[%c0_15, %c768] : memref<1x2688xf32, #tpu.memory_space<vmem>>, vector<1x128xf32>
    %26 = vector.broadcast %25 : vector<1x128xf32> to vector<16x128xf32>
    %27 = arith.addf %24, %26 : vector<16x128xf32>
    %28 = arith.truncf %27 : vector<16x128xf32> to vector<16x128xbf16>
    %c0_16 = arith.constant 0 : index
    %c0_17 = arith.constant 0 : index
    %29 = vector.load %arg5[%c0_16, %c0_17] : memref<128x384xbf16, #tpu.memory_space<vmem>>, vector<128x384xbf16>
    %cst_18 = arith.constant dense<0.000000e+00> : vector<16x384xf32>
    %30 = tpu.matmul %28, %29, %cst_18 {dimension_numbers = #tpu.dot_dimension_numbers<[1], [0], [0], [1], [0, 0, 1, 1], [], []>} : vector<16x128xbf16>, vector<128x384xbf16>, vector<16x384xf32> -> vector<16x384xf32>
    %c0_19 = arith.constant 0 : index
    %c896 = arith.constant 896 : index
    %31 = vector.load %arg10[%c0_19, %c896] : memref<1x2688xf32, #tpu.memory_space<vmem>>, vector<1x384xf32>
    %32 = vector.broadcast %31 : vector<1x384xf32> to vector<16x384xf32>
    %33 = arith.addf %30, %32 : vector<16x384xf32>
    %34 = vector.extract_strided_slice %33 {offsets = [0, 0], sizes = [16, 128], strides = [1, 1]} : vector<16x384xf32> to vector<16x128xf32>
    %35 = vector.shape_cast %34 : vector<16x128xf32> to vector<2x8x128xf32>
    %36 = vector.extract_strided_slice %33 {offsets = [0, 128], sizes = [16, 128], strides = [1, 1]} : vector<16x384xf32> to vector<16x128xf32>
    %37 = vector.shape_cast %36 : vector<16x128xf32> to vector<2x8x128xf32>
    %38 = vector.extract_strided_slice %33 {offsets = [0, 256], sizes = [16, 128], strides = [1, 1]} : vector<16x384xf32> to vector<16x128xf32>
    %39 = vector.shape_cast %38 : vector<16x128xf32> to vector<2x8x128xf32>
    %40 = vector.extract_strided_slice %35 {offsets = [0, 0, 0], sizes = [2, 8, 32], strides = [1, 1, 1]} : vector<2x8x128xf32> to vector<2x8x32xf32>
    %41 = arith.truncf %40 : vector<2x8x32xf32> to vector<2x8x32xbf16>
    %42 = vector.extract_strided_slice %37 {offsets = [0, 0, 0], sizes = [2, 8, 32], strides = [1, 1, 1]} : vector<2x8x128xf32> to vector<2x8x32xf32>
    %43 = arith.truncf %42 : vector<2x8x32xf32> to vector<2x8x32xbf16>
    %44 = vector.extract_strided_slice %39 {offsets = [0, 0, 0], sizes = [2, 8, 32], strides = [1, 1, 1]} : vector<2x8x128xf32> to vector<2x8x32xf32>
    %45 = arith.truncf %44 : vector<2x8x32xf32> to vector<2x8x32xbf16>
    "tpu.trace_start"() <{level = 10 : i32, message = "bqd,bkd->bqk"}> : () -> ()
    %cst_20 = arith.constant dense<0.000000e+00> : vector<2x8x8xf32>
    %46 = tpu.matmul %41, %43, %cst_20 {dimension_numbers = #tpu.dot_dimension_numbers<[2], [2], [1], [1], [0, 0, 0, 1, 1, 1], [0], [0]>} : vector<2x8x32xbf16>, vector<2x8x32xbf16>, vector<2x8x8xf32> -> vector<2x8x8xf32>
    "tpu.trace_stop"() : () -> ()
    %cst_21 = arith.constant 0.176776692 : f32
    %47 = vector.broadcast %cst_21 : f32 to vector<2x8x8xf32>
    %48 = arith.mulf %46, %47 : vector<2x8x8xf32>
    %cst_22 = arith.constant dense<0xFF800000> : vector<2x8xf32>
    %49 = vector.multi_reduction <maximumf>, %48, %cst_22 [2] : vector<2x8x8xf32> to vector<2x8xf32>
    %50 = vector.shape_cast %49 : vector<2x8xf32> to vector<2x8x1xf32>
    %51 = vector.broadcast %50 : vector<2x8x1xf32> to vector<2x8x8xf32>
    %52 = arith.subf %48, %51 : vector<2x8x8xf32>
    %53 = math.exp %52 : vector<2x8x8xf32>
    %cst_23 = arith.constant dense<0.000000e+00> : vector<2x8xf32>
    %54 = vector.multi_reduction <add>, %53, %cst_23 [2] : vector<2x8x8xf32> to vector<2x8xf32>
    %55 = vector.shape_cast %54 : vector<2x8xf32> to vector<2x8x1xf32>
    %56 = vector.broadcast %55 : vector<2x8x1xf32> to vector<2x8x8xf32>
    %57 = arith.divf %53, %56 : vector<2x8x8xf32>
    %58 = arith.truncf %57 : vector<2x8x8xf32> to vector<2x8x8xbf16>
    "tpu.trace_start"() <{level = 10 : i32, message = "bqk,bkd->bqd"}> : () -> ()
    %cst_24 = arith.constant dense<0.000000e+00> : vector<2x8x32xf32>
    %59 = tpu.matmul %58, %45, %cst_24 {dimension_numbers = #tpu.dot_dimension_numbers<[2], [1], [1], [2], [0, 0, 0, 1, 1, 2], [0], [0]>} : vector<2x8x8xbf16>, vector<2x8x32xbf16>, vector<2x8x32xf32> -> vector<2x8x32xf32>
    "tpu.trace_stop"() : () -> ()
    %60 = vector.extract_strided_slice %35 {offsets = [0, 0, 32], sizes = [2, 8, 32], strides = [1, 1, 1]} : vector<2x8x128xf32> to vector<2x8x32xf32>
    %61 = arith.truncf %60 : vector<2x8x32xf32> to vector<2x8x32xbf16>
    %62 = vector.extract_strided_slice %37 {offsets = [0, 0, 32], sizes = [2, 8, 32], strides = [1, 1, 1]} : vector<2x8x128xf32> to vector<2x8x32xf32>
    %63 = arith.truncf %62 : vector<2x8x32xf32> to vector<2x8x32xbf16>
    %64 = vector.extract_strided_slice %39 {offsets = [0, 0, 32], sizes = [2, 8, 32], strides = [1, 1, 1]} : vector<2x8x128xf32> to vector<2x8x32xf32>
    %65 = arith.truncf %64 : vector<2x8x32xf32> to vector<2x8x32xbf16>
    "tpu.trace_start"() <{level = 10 : i32, message = "bqd,bkd->bqk"}> : () -> ()
    %cst_25 = arith.constant dense<0.000000e+00> : vector<2x8x8xf32>
    %66 = tpu.matmul %61, %63, %cst_25 {dimension_numbers = #tpu.dot_dimension_numbers<[2], [2], [1], [1], [0, 0, 0, 1, 1, 1], [0], [0]>} : vector<2x8x32xbf16>, vector<2x8x32xbf16>, vector<2x8x8xf32> -> vector<2x8x8xf32>
    "tpu.trace_stop"() : () -> ()
    %cst_26 = arith.constant 0.176776692 : f32
    %67 = vector.broadcast %cst_26 : f32 to vector<2x8x8xf32>
    %68 = arith.mulf %66, %67 : vector<2x8x8xf32>
    %cst_27 = arith.constant dense<0xFF800000> : vector<2x8xf32>
    %69 = vector.multi_reduction <maximumf>, %68, %cst_27 [2] : vector<2x8x8xf32> to vector<2x8xf32>
    %70 = vector.shape_cast %69 : vector<2x8xf32> to vector<2x8x1xf32>
    %71 = vector.broadcast %70 : vector<2x8x1xf32> to vector<2x8x8xf32>
    %72 = arith.subf %68, %71 : vector<2x8x8xf32>
    %73 = math.exp %72 : vector<2x8x8xf32>
    %cst_28 = arith.constant dense<0.000000e+00> : vector<2x8xf32>
    %74 = vector.multi_reduction <add>, %73, %cst_28 [2] : vector<2x8x8xf32> to vector<2x8xf32>
    %75 = vector.shape_cast %74 : vector<2x8xf32> to vector<2x8x1xf32>
    %76 = vector.broadcast %75 : vector<2x8x1xf32> to vector<2x8x8xf32>
    %77 = arith.divf %73, %76 : vector<2x8x8xf32>
    %78 = arith.truncf %77 : vector<2x8x8xf32> to vector<2x8x8xbf16>
    "tpu.trace_start"() <{level = 10 : i32, message = "bqk,bkd->bqd"}> : () -> ()
    %cst_29 = arith.constant dense<0.000000e+00> : vector<2x8x32xf32>
    %79 = tpu.matmul %78, %65, %cst_29 {dimension_numbers = #tpu.dot_dimension_numbers<[2], [1], [1], [2], [0, 0, 0, 1, 1, 2], [0], [0]>} : vector<2x8x8xbf16>, vector<2x8x32xbf16>, vector<2x8x32xf32> -> vector<2x8x32xf32>
    "tpu.trace_stop"() : () -> ()
    %80 = vector.extract_strided_slice %35 {offsets = [0, 0, 64], sizes = [2, 8, 32], strides = [1, 1, 1]} : vector<2x8x128xf32> to vector<2x8x32xf32>
    %81 = arith.truncf %80 : vector<2x8x32xf32> to vector<2x8x32xbf16>
    %82 = vector.extract_strided_slice %37 {offsets = [0, 0, 64], sizes = [2, 8, 32], strides = [1, 1, 1]} : vector<2x8x128xf32> to vector<2x8x32xf32>
    %83 = arith.truncf %82 : vector<2x8x32xf32> to vector<2x8x32xbf16>
    %84 = vector.extract_strided_slice %39 {offsets = [0, 0, 64], sizes = [2, 8, 32], strides = [1, 1, 1]} : vector<2x8x128xf32> to vector<2x8x32xf32>
    %85 = arith.truncf %84 : vector<2x8x32xf32> to vector<2x8x32xbf16>
    "tpu.trace_start"() <{level = 10 : i32, message = "bqd,bkd->bqk"}> : () -> ()
    %cst_30 = arith.constant dense<0.000000e+00> : vector<2x8x8xf32>
    %86 = tpu.matmul %81, %83, %cst_30 {dimension_numbers = #tpu.dot_dimension_numbers<[2], [2], [1], [1], [0, 0, 0, 1, 1, 1], [0], [0]>} : vector<2x8x32xbf16>, vector<2x8x32xbf16>, vector<2x8x8xf32> -> vector<2x8x8xf32>
    "tpu.trace_stop"() : () -> ()
    %cst_31 = arith.constant 0.176776692 : f32
    %87 = vector.broadcast %cst_31 : f32 to vector<2x8x8xf32>
    %88 = arith.mulf %86, %87 : vector<2x8x8xf32>
    %cst_32 = arith.constant dense<0xFF800000> : vector<2x8xf32>
    %89 = vector.multi_reduction <maximumf>, %88, %cst_32 [2] : vector<2x8x8xf32> to vector<2x8xf32>
    %90 = vector.shape_cast %89 : vector<2x8xf32> to vector<2x8x1xf32>
    %91 = vector.broadcast %90 : vector<2x8x1xf32> to vector<2x8x8xf32>
    %92 = arith.subf %88, %91 : vector<2x8x8xf32>
    %93 = math.exp %92 : vector<2x8x8xf32>
    %cst_33 = arith.constant dense<0.000000e+00> : vector<2x8xf32>
    %94 = vector.multi_reduction <add>, %93, %cst_33 [2] : vector<2x8x8xf32> to vector<2x8xf32>
    %95 = vector.shape_cast %94 : vector<2x8xf32> to vector<2x8x1xf32>
    %96 = vector.broadcast %95 : vector<2x8x1xf32> to vector<2x8x8xf32>
    %97 = arith.divf %93, %96 : vector<2x8x8xf32>
    %98 = arith.truncf %97 : vector<2x8x8xf32> to vector<2x8x8xbf16>
    "tpu.trace_start"() <{level = 10 : i32, message = "bqk,bkd->bqd"}> : () -> ()
    %cst_34 = arith.constant dense<0.000000e+00> : vector<2x8x32xf32>
    %99 = tpu.matmul %98, %85, %cst_34 {dimension_numbers = #tpu.dot_dimension_numbers<[2], [1], [1], [2], [0, 0, 0, 1, 1, 2], [0], [0]>} : vector<2x8x8xbf16>, vector<2x8x32xbf16>, vector<2x8x32xf32> -> vector<2x8x32xf32>
    "tpu.trace_stop"() : () -> ()
    %100 = vector.extract_strided_slice %35 {offsets = [0, 0, 96], sizes = [2, 8, 32], strides = [1, 1, 1]} : vector<2x8x128xf32> to vector<2x8x32xf32>
    %101 = arith.truncf %100 : vector<2x8x32xf32> to vector<2x8x32xbf16>
    %102 = vector.extract_strided_slice %37 {offsets = [0, 0, 96], sizes = [2, 8, 32], strides = [1, 1, 1]} : vector<2x8x128xf32> to vector<2x8x32xf32>
    %103 = arith.truncf %102 : vector<2x8x32xf32> to vector<2x8x32xbf16>
    %104 = vector.extract_strided_slice %39 {offsets = [0, 0, 96], sizes = [2, 8, 32], strides = [1, 1, 1]} : vector<2x8x128xf32> to vector<2x8x32xf32>
    %105 = arith.truncf %104 : vector<2x8x32xf32> to vector<2x8x32xbf16>
    "tpu.trace_start"() <{level = 10 : i32, message = "bqd,bkd->bqk"}> : () -> ()
    %cst_35 = arith.constant dense<0.000000e+00> : vector<2x8x8xf32>
    %106 = tpu.matmul %101, %103, %cst_35 {dimension_numbers = #tpu.dot_dimension_numbers<[2], [2], [1], [1], [0, 0, 0, 1, 1, 1], [0], [0]>} : vector<2x8x32xbf16>, vector<2x8x32xbf16>, vector<2x8x8xf32> -> vector<2x8x8xf32>
    "tpu.trace_stop"() : () -> ()
    %cst_36 = arith.constant 0.176776692 : f32
    %107 = vector.broadcast %cst_36 : f32 to vector<2x8x8xf32>
    %108 = arith.mulf %106, %107 : vector<2x8x8xf32>
    %cst_37 = arith.constant dense<0xFF800000> : vector<2x8xf32>
    %109 = vector.multi_reduction <maximumf>, %108, %cst_37 [2] : vector<2x8x8xf32> to vector<2x8xf32>
    %110 = vector.shape_cast %109 : vector<2x8xf32> to vector<2x8x1xf32>
    %111 = vector.broadcast %110 : vector<2x8x1xf32> to vector<2x8x8xf32>
    %112 = arith.subf %108, %111 : vector<2x8x8xf32>
    %113 = math.exp %112 : vector<2x8x8xf32>
    %cst_38 = arith.constant dense<0.000000e+00> : vector<2x8xf32>
    %114 = vector.multi_reduction <add>, %113, %cst_38 [2] : vector<2x8x8xf32> to vector<2x8xf32>
    %115 = vector.shape_cast %114 : vector<2x8xf32> to vector<2x8x1xf32>
    %116 = vector.broadcast %115 : vector<2x8x1xf32> to vector<2x8x8xf32>
    %117 = arith.divf %113, %116 : vector<2x8x8xf32>
    %118 = arith.truncf %117 : vector<2x8x8xf32> to vector<2x8x8xbf16>
    "tpu.trace_start"() <{level = 10 : i32, message = "bqk,bkd->bqd"}> : () -> ()
    %cst_39 = arith.constant dense<0.000000e+00> : vector<2x8x32xf32>
    %119 = tpu.matmul %118, %105, %cst_39 {dimension_numbers = #tpu.dot_dimension_numbers<[2], [1], [1], [2], [0, 0, 0, 1, 1, 2], [0], [0]>} : vector<2x8x8xbf16>, vector<2x8x32xbf16>, vector<2x8x32xf32> -> vector<2x8x32xf32>
    "tpu.trace_stop"() : () -> ()
    %120 = tpu.concatenate %59, %79, %99, %119 in 2 : vector<2x8x32xf32>, vector<2x8x32xf32>, vector<2x8x32xf32>, vector<2x8x32xf32> -> vector<2x8x128xf32>
    %121 = vector.shape_cast %120 : vector<2x8x128xf32> to vector<16x128xf32>
    %122 = arith.truncf %121 : vector<16x128xf32> to vector<16x128xbf16>
    %c0_40 = arith.constant 0 : index
    %c0_41 = arith.constant 0 : index
    %123 = vector.load %arg6[%c0_40, %c0_41] : memref<128x128xbf16, #tpu.memory_space<vmem>>, vector<128x128xbf16>
    %cst_42 = arith.constant dense<0.000000e+00> : vector<16x128xf32>
    %124 = tpu.matmul %122, %123, %cst_42 {dimension_numbers = #tpu.dot_dimension_numbers<[1], [0], [0], [1], [0, 0, 1, 1], [], []>} : vector<16x128xbf16>, vector<128x128xbf16>, vector<16x128xf32> -> vector<16x128xf32>
    %c0_43 = arith.constant 0 : index
    %c1280 = arith.constant 1280 : index
    %125 = vector.load %arg10[%c0_43, %c1280] : memref<1x2688xf32, #tpu.memory_space<vmem>>, vector<1x128xf32>
    %126 = vector.broadcast %125 : vector<1x128xf32> to vector<16x128xf32>
    %127 = arith.addf %124, %126 : vector<16x128xf32>
    %128 = arith.addf %27, %127 : vector<16x128xf32>
    %c0_44 = arith.constant 0 : index
    %c1408 = arith.constant 1408 : index
    %129 = vector.load %arg10[%c0_44, %c1408] : memref<1x2688xf32, #tpu.memory_space<vmem>>, vector<1x128xf32>
    %c0_45 = arith.constant 0 : index
    %c1536 = arith.constant 1536 : index
    %130 = vector.load %arg10[%c0_45, %c1536] : memref<1x2688xf32, #tpu.memory_space<vmem>>, vector<1x128xf32>
    %cst_46 = arith.constant dense<0.000000e+00> : vector<16xf32>
    %131 = vector.multi_reduction <add>, %128, %cst_46 [1] : vector<16x128xf32> to vector<16xf32>
    %132 = vector.shape_cast %131 : vector<16xf32> to vector<16x1xf32>
    %cst_47 = arith.constant 1.280000e+02 : f32
    %133 = vector.broadcast %cst_47 : f32 to vector<16x1xf32>
    %134 = arith.divf %132, %133 : vector<16x1xf32>
    %135 = vector.broadcast %134 : vector<16x1xf32> to vector<16x128xf32>
    %136 = arith.subf %128, %135 : vector<16x128xf32>
    %137 = arith.mulf %136, %136 : vector<16x128xf32>
    %cst_48 = arith.constant dense<0.000000e+00> : vector<16xf32>
    %138 = vector.multi_reduction <add>, %137, %cst_48 [1] : vector<16x128xf32> to vector<16xf32>
    %139 = vector.shape_cast %138 : vector<16xf32> to vector<16x1xf32>
    %cst_49 = arith.constant 1.280000e+02 : f32
    %140 = vector.broadcast %cst_49 : f32 to vector<16x1xf32>
    %141 = arith.divf %139, %140 : vector<16x1xf32>
    %cst_50 = arith.constant 9.99999974E-6 : f32
    %142 = vector.broadcast %cst_50 : f32 to vector<16x1xf32>
    %143 = arith.addf %141, %142 : vector<16x1xf32>
    %144 = math.rsqrt %143 : vector<16x1xf32>
    %145 = vector.broadcast %134 : vector<16x1xf32> to vector<16x128xf32>
    %146 = arith.subf %128, %145 : vector<16x128xf32>
    %147 = vector.broadcast %144 : vector<16x1xf32> to vector<16x128xf32>
    %148 = arith.mulf %146, %147 : vector<16x128xf32>
    %149 = vector.broadcast %129 : vector<1x128xf32> to vector<16x128xf32>
    %150 = arith.mulf %148, %149 : vector<16x128xf32>
    %151 = vector.broadcast %130 : vector<1x128xf32> to vector<16x128xf32>
    %152 = arith.addf %150, %151 : vector<16x128xf32>
    %153 = arith.truncf %152 : vector<16x128xf32> to vector<16x128xbf16>
    %c0_51 = arith.constant 0 : index
    %c0_52 = arith.constant 0 : index
    %154 = vector.load %arg7[%c0_51, %c0_52] : memref<128x256xbf16, #tpu.memory_space<vmem>>, vector<128x256xbf16>
    %cst_53 = arith.constant dense<0.000000e+00> : vector<16x256xf32>
    %155 = tpu.matmul %153, %154, %cst_53 {dimension_numbers = #tpu.dot_dimension_numbers<[1], [0], [0], [1], [0, 0, 1, 1], [], []>} : vector<16x128xbf16>, vector<128x256xbf16>, vector<16x256xf32> -> vector<16x256xf32>
    %c0_54 = arith.constant 0 : index
    %c1664 = arith.constant 1664 : index
    %156 = vector.load %arg10[%c0_54, %c1664] : memref<1x2688xf32, #tpu.memory_space<vmem>>, vector<1x256xf32>
    %157 = vector.broadcast %156 : vector<1x256xf32> to vector<16x256xf32>
    %158 = arith.addf %155, %157 : vector<16x256xf32>
    %cst_55 = arith.constant 0.000000e+00 : f32
    %159 = vector.broadcast %cst_55 : f32 to vector<16x256xf32>
    %160 = arith.maximumf %158, %159 : vector<16x256xf32>
    %161 = arith.truncf %160 : vector<16x256xf32> to vector<16x256xbf16>
    %c0_56 = arith.constant 0 : index
    %c0_57 = arith.constant 0 : index
    %162 = vector.load %arg8[%c0_56, %c0_57] : memref<256x512xbf16, #tpu.memory_space<vmem>>, vector<256x512xbf16>
    %cst_58 = arith.constant dense<0.000000e+00> : vector<16x512xf32>
    %163 = tpu.matmul %161, %162, %cst_58 {dimension_numbers = #tpu.dot_dimension_numbers<[1], [0], [0], [1], [0, 0, 1, 1], [], []>} : vector<16x256xbf16>, vector<256x512xbf16>, vector<16x512xf32> -> vector<16x512xf32>
    %c0_59 = arith.constant 0 : index
    %c1920 = arith.constant 1920 : index
    %164 = vector.load %arg10[%c0_59, %c1920] : memref<1x2688xf32, #tpu.memory_space<vmem>>, vector<1x512xf32>
    %165 = vector.broadcast %164 : vector<1x512xf32> to vector<16x512xf32>
    %166 = arith.addf %163, %165 : vector<16x512xf32>
    %cst_60 = arith.constant 0.000000e+00 : f32
    %167 = vector.broadcast %cst_60 : f32 to vector<16x512xf32>
    %168 = arith.maximumf %166, %167 : vector<16x512xf32>
    %169 = arith.truncf %168 : vector<16x512xf32> to vector<16x512xbf16>
    %c0_61 = arith.constant 0 : index
    %c0_62 = arith.constant 0 : index
    %170 = vector.load %arg9[%c0_61, %c0_62] : memref<512x32xbf16, #tpu.memory_space<vmem>>, vector<512x32xbf16>
    %cst_63 = arith.constant dense<0.000000e+00> : vector<16x32xf32>
    %171 = tpu.matmul %169, %170, %cst_63 {dimension_numbers = #tpu.dot_dimension_numbers<[1], [0], [0], [1], [0, 0, 1, 1], [], []>} : vector<16x512xbf16>, vector<512x32xbf16>, vector<16x32xf32> -> vector<16x32xf32>
    %c0_64 = arith.constant 0 : index
    %c2432 = arith.constant 2432 : index
    %172 = vector.load %arg10[%c0_64, %c2432] : memref<1x2688xf32, #tpu.memory_space<vmem>>, vector<1x32xf32>
    %173 = vector.broadcast %172 : vector<1x32xf32> to vector<16x32xf32>
    %174 = arith.addf %171, %173 : vector<16x32xf32>
    %175 = arith.addf %174, %13 : vector<16x32xf32>
    %c0_65 = arith.constant 0 : index
    %c0_66 = arith.constant 0 : index
    %176 = vector.load %arg11[%c0_65, %c0_66] : memref<16x32xf32, #tpu.memory_space<vmem>>, vector<16x32xf32>
    tpu.vector_store %arg11[%c0_65, %c0_66], %175 {strides = array<i32>} : memref<16x32xf32, #tpu.memory_space<vmem>>, vector<16x32xf32>,
    return
  }
  func.func @transform_0(%arg0: i32) -> (i32, i32) {
    %c0_i32 = arith.constant 0 : i32
    %c0_i32_0 = arith.constant 0 : i32
    return %arg0, %c0_i32 : i32, i32
  }
  func.func @transform_1(%arg0: i32) -> (i32, i32) {
    %c0_i32 = arith.constant 0 : i32
    %c0_i32_0 = arith.constant 0 : i32
    %c0_i32_1 = arith.constant 0 : i32
    return %c0_i32, %c0_i32_0 : i32, i32
  }
  func.func @transform_2(%arg0: i32) -> (i32, i32) {
    %c0_i32 = arith.constant 0 : i32
    %c0_i32_0 = arith.constant 0 : i32
    %c0_i32_1 = arith.constant 0 : i32
    return %c0_i32, %c0_i32_0 : i32, i32
  }
  func.func @transform_3(%arg0: i32) -> (i32, i32) {
    %c0_i32 = arith.constant 0 : i32
    %c0_i32_0 = arith.constant 0 : i32
    %c0_i32_1 = arith.constant 0 : i32
    return %c0_i32, %c0_i32_0 : i32, i32
  }
  func.func @transform_4(%arg0: i32) -> (i32, i32) {
    %c0_i32 = arith.constant 0 : i32
    %c0_i32_0 = arith.constant 0 : i32
    %c0_i32_1 = arith.constant 0 : i32
    return %c0_i32, %c0_i32_0 : i32, i32
  }
  func.func @transform_5(%arg0: i32) -> (i32, i32) {
    %c0_i32 = arith.constant 0 : i32
    %c0_i32_0 = arith.constant 0 : i32
    %c0_i32_1 = arith.constant 0 : i32
    return %c0_i32, %c0_i32_0 : i32, i32
  }
  func.func @transform_6(%arg0: i32) -> (i32, i32) {
    %c0_i32 = arith.constant 0 : i32
    %c0_i32_0 = arith.constant 0 : i32
    %c0_i32_1 = arith.constant 0 : i32
    return %c0_i32, %c0_i32_0 : i32, i32
  }
  func.func @transform_7(%arg0: i32) -> (i32, i32) {
    %c0_i32 = arith.constant 0 : i32
    %c0_i32_0 = arith.constant 0 : i32
    %c0_i32_1 = arith.constant 0 : i32
    return %c0_i32, %c0_i32_0 : i32, i32
  }
  func.func @transform_8(%arg0: i32) -> (i32, i32) {
    %c0_i32 = arith.constant 0 : i32
    %c0_i32_0 = arith.constant 0 : i32
    %c0_i32_1 = arith.constant 0 : i32
    return %c0_i32, %c0_i32_0 : i32, i32
  }
  func.func @transform_9(%arg0: i32) -> (i32, i32) {
    %c0_i32 = arith.constant 0 : i32
    %c0_i32_0 = arith.constant 0 : i32
    %c0_i32_1 = arith.constant 0 : i32
    return %c0_i32, %c0_i32_0 : i32, i32
  }
  func.func @transform_10(%arg0: i32) -> (i32, i32) {
    %c0_i32 = arith.constant 0 : i32
    %c0_i32_0 = arith.constant 0 : i32
    return %arg0, %c0_i32 : i32, i32
  }
}

</mosaic_0001>

<bundles_post_ra>
// kernel: soh_predictor2.1
= control target key start
LH: loop header
LB: loop body
LE: loop exit
PB: predicated region body
PF: predicated region fallthrough
CT: control target
= control target key end

     0   :  { %15 = vsyncpa [#allocation3], 0  ;;  %s5086_s0 = inlined_call_operand.hbm [shape: f32[16,32], index: 0, kind: input, shape index: {}]   ;;  %s5087_s1 = inlined_call_operand.hbm [shape: bf16[32,544], index: 1, kind: input, shape index: {}]   ;;  %s5088_s2 = inlined_call_operand.hbm [shape: bf16[512,256], index: 2, kind: input, shape index: {}]   ;;  %s5089_s3 = inlined_call_operand.vmem [shape: bf16[256,128], index: 3, kind: input, shape index: {}]   ;;  %s5090_s4 = inlined_call_operand.vmem [shape: bf16[128,384], index: 4, kind: input, shape index: {}]   ;;  %s5091_s5 = inlined_call_operand.hbm [shape: bf16[128,128], index: 5, kind: input, shape index: {}]   ;;  %s5092_s6 = inlined_call_operand.hbm [shape: bf16[128,256], index: 6, kind: input, shape index: {}]   ;;  %s5093_s7 = inlined_call_operand.hbm [shape: bf16[256,512], index: 7, kind: input, shape index: {}]   ;;  %s5094_s8 = inlined_call_operand.vmem [shape: bf16[512,32], index: 8, kind: input, shape index: {}]   ;;  %s5095_s9 = inlined_call_operand.hbm [shape: f32[1,2688], index: 9, kind: input, shape index: {}]   ;;  %s5096_s10 = inlined_call_operand.hbm [shape: f32[16,32], index: 10, kind: output, shape index: {}]  }
   0x1   :  { %16 = vsyncpa [#allocation6], 0 }
   0x2   :  { %17 = vsyncpa [#allocation9], 0 }
   0x3   :  { %18 = vsyncpa [#allocation12], 0 }
   0x4   :  { %19 = vsyncpa [#allocation4], 0  ;;  %s4496_s13 = smov [#allocation5]  }
   0x5   :  { %s37_s14 = sshll.u32 %s4496_s13, 4  ;;  %s38_s14 = int_to_ptr.vmem [resolvable:$true] %s37_s14 }
   0x6   :  { %s4334_s15 = scalar_lea.vmem %s38_s14, 1280  ;;  %p4339_p1 = scmp.lt.s32.totalorder %s38_s14, %s38_s14 }
   0x7   :  { %p4335_p0 = scmp.ne.s32.totalorder %s38_s14, %s4334_s15  ;;  %p4340_p2 = scmp.lt.s32.totalorder %s4334_s15, %s4334_s15 }
   0x9   :  { %p4341_p3 = por %p4340_p2, %p4339_p1 }
   0xb   :  { %p4342_p4 = pnand %p4341_p3, %p4335_p0 }
   0xd   :  { %4345 = shalt.err (!%p4342_p4)
}
   0xe   :  { %s4497_s16 = smov 320   ;;  %s4498_s17 = smov 20  }
   0xf   :  { %43 = dma.hbm_to_vmem [thread:$0]  %s5087_s1, 1280, %s38_s14, [#allocation6], %s4497_s16, %s4497_s16, %s4498_s17  }
  0x10   :  { %s4499_s20 = smov [#allocation8]  }
  0x11   :  { %s65_s21 = sshll.u32 %s4499_s20, 4  ;;  %s66_s21 = int_to_ptr.vmem [resolvable:$true] %s65_s21 }
  0x12   :  { %s4354_s22 = scalar_lea.vmem %s66_s21, 1024  ;;  %p4359_p6 = scmp.lt.s32.totalorder %s66_s21, %s66_s21 }
  0x13   :  { %p4355_p5 = scmp.ne.s32.totalorder %s66_s21, %s4354_s22  ;;  %p4360_p7 = scmp.lt.s32.totalorder %s4354_s22, %s4354_s22 }
  0x15   :  { %p4361_p8 = por %p4360_p7, %p4359_p6 }
  0x17   :  { %p4362_p9 = pnand %p4361_p8, %p4355_p5 }
  0x19   :  { %4365 = shalt.err (!%p4362_p9)
}
  0x1a   :  { %s4500_s23 = smov 64   ;;  %s4501_s24 = smov 4  }
  0x1b   :  { %71 = dma.hbm_to_vmem [thread:$0]  %s5091_s5, 1024, %s66_s21, [#allocation9], %s4500_s23, %s4500_s23, %s4501_s24  }
  0x1c   :  { %s4502_s27 = smov [#allocation11]  }
  0x1d   :  { %s89_s1 = sshll.u32 %s4502_s27, 4  ;;  %s90_s1 = int_to_ptr.vmem [resolvable:$true] %s89_s1 }
  0x1e   :  { %s4374_s28 = scalar_lea.vmem %s90_s1, 8192  ;;  %p4379_p11 = scmp.lt.s32.totalorder %s90_s1, %s90_s1 }
  0x1f   :  { %p4375_p10 = scmp.ne.s32.totalorder %s90_s1, %s4374_s28  ;;  %p4380_p12 = scmp.lt.s32.totalorder %s4374_s28, %s4374_s28 }
  0x21   :  { %p4381_p13 = por %p4380_p12, %p4379_p11 }
  0x23   :  { %p4382_p0 = pnand %p4381_p13, %p4375_p10 }
  0x25   :  { %4385 = shalt.err (!%p4382_p0)
}
  0x26   :  { %s4503_s29 = smov 256   ;;  %s4504_s30 = smov 16  }
  0x27   :  { %95 = dma.hbm_to_vmem [thread:$0]  %s5093_s7, 8192, %s90_s1, [#allocation12], %s4503_s29, %s4503_s29, %s4504_s30  }
  0x28   :  { %s4505_s13 = smov [#allocation2]  }
  0x29   :  { %s25_s14 = sshll.u32 %s4505_s13, 4  ;;  %s26_s14 = int_to_ptr.vmem [resolvable:$true] %s25_s14 }
  0x2a   :  { %s4394_s5 = scalar_lea.vmem %s26_s14, 256  ;;  %p4399_p2 = scmp.lt.s32.totalorder %s26_s14, %s26_s14 }
  0x2b   :  { %p4395_p1 = scmp.ne.s32.totalorder %s26_s14, %s4394_s5  ;;  %p4400_p3 = scmp.lt.s32.totalorder %s4394_s5, %s4394_s5 }
  0x2d   :  { %p4401_p4 = por %p4400_p3, %p4399_p2 }
  0x2f   :  { %p4402_p5 = pnand %p4401_p4, %p4395_p1 }
  0x31   :  { %4405 = shalt.err (!%p4402_p5)
}
  0x32   :  { %s4506_s15 = smov 128   ;;  %s4507_s16 = smov 8  }
  0x33   :  { %31 = dma.hbm_to_vmem [thread:$0]  %s5086_s0, 256, %s26_s14, [#allocation3], %s4506_s15, %s4506_s15, %s4507_s16  }
  0x34   :  { %s4508_s7 = smov [#allocation7]   ;;  %s4509_s20 = smov [#allocation10]  }
  0x35   :  { %s49_s19 = sshll.u32 %s4508_s7, 4  ;;  %s77_s21 = sshll.u32 %s4509_s20, 4  ;;  %s50_s19 = int_to_ptr.vmem [resolvable:$true] %s49_s19  ;;  %s78_s21 = int_to_ptr.vmem [resolvable:$true] %s77_s21 }
  0x36   :  { %s4414_s22 = scalar_lea.vmem %s50_s19, 8192  ;;  %p4419_p7 = scmp.lt.s32.totalorder %s50_s19, %s50_s19 }
  0x37   :  { %p4415_p6 = scmp.ne.s32.totalorder %s50_s19, %s4414_s22  ;;  %p4420_p8 = scmp.lt.s32.totalorder %s4414_s22, %s4414_s22 }
  0x39   :  { %p4421_p9 = por %p4420_p8, %p4419_p7 }
  0x3b   :  { %p4422_p10 = pnand %p4421_p9, %p4415_p6 }
  0x3d   :  { %4425 = shalt.err (!%p4422_p10)
}
  0x3e   :  { %55 = dma.hbm_to_vmem [thread:$0]  %s5088_s2, 8192, %s50_s19, [#allocation6], %s4506_s15, %s4506_s15, %s4507_s16  }
  0x3f   :  { %s4434_s0 = scalar_lea.vmem %s78_s21, 2048  ;;  %p4439_p12 = scmp.lt.s32.totalorder %s78_s21, %s78_s21 }
  0x40   :  { %p4435_p11 = scmp.ne.s32.totalorder %s78_s21, %s4434_s0  ;;  %p4440_p13 = scmp.lt.s32.totalorder %s4434_s0, %s4434_s0 }
  0x42   :  { %p4441_p0 = por %p4440_p13, %p4439_p12 }
  0x44   :  { %p4442_p1 = pnand %p4441_p0, %p4435_p11 }
  0x46   :  { %4445 = shalt.err (!%p4442_p1)
}
  0x47   :  { %83 = dma.hbm_to_vmem [thread:$0]  %s5092_s6, 2048, %s78_s21, [#allocation9], %s4506_s15, %s4506_s15, %s4507_s16  }
  0x48   :  { %s4510_s1 = smov [#allocation13]  }
  0x49   :  { %s104_s28 = sshll.u32 %s4510_s1, 4  ;;  %s105_s28 = int_to_ptr.vmem [resolvable:$true] %s104_s28 }
  0x4a   :  { %s4454_s29 = scalar_lea.vmem %s105_s28, 336  ;;  %s4458_s2 = scalar_lea.vmem %s105_s28, 352 }
  0x4b   :  { %p4455_p2 = scmp.ne.s32.totalorder %s105_s28, %s4454_s29  ;;  %p4459_p3 = scmp.lt.s32.totalorder %s105_s28, %s105_s28 }
  0x4c   :  { %p4460_p4 = scmp.lt.s32.totalorder %s4458_s2, %s4454_s29 }
  0x4e   :  { %p4461_p5 = por %p4460_p4, %p4459_p3 }
  0x50   :  { %p4462_p6 = pnand %p4461_p5, %p4455_p2 }
  0x52   :  { %4465 = shalt.err (!%p4462_p6)
}
  0x53   :  { %107 = dma.hbm_to_vmem [thread:$0]  %s5095_s9, 336, %s105_s28, [#allocation12]  }
  0x54   :  { %4486 = dma.done.wait [#allocation3], 256  }
  0x55   :  { %4487 = vsyncadd [#allocation3], 4294967040 }
  0x56   :  { %4488 = dma.done.wait [#allocation6], 9472  }
  0x57   :  { %4489 = vsyncadd [#allocation6], 4294957824 }
  0x58   :  { %4490 = dma.done.wait [#allocation9], 3072  }
  0x59   :  { %4491 = vsyncadd [#allocation9], 4294964224 }
  0x5a   :  { %4492 = dma.done.wait [#allocation12], 8528  }
  0x5b   :  { %4493 = vsyncadd [#allocation12], 4294958768  ;;  %v4511_v0 = vmov 0   ;;  %v3972_v1 = vld [vmem:[#allocation5 + $0x2c] ss:$20 sps:$4 sm:$0xff]   ;;  %v130_v9 = vld [vmem:[#allocation2] sm:$0xff] }
  0x5c   :  { %233 = vmatprep.mubr.bf16.mxu0 %v4511_v0  ;;  %276 = vmatprep.mubr.bf16.mxu1 %v4511_v0  ;;  %v3974_v2 = vld [vmem:[#allocation5 + $0x34] ss:$20 sps:$4 sm:$0xff]   ;;  %v3977_v4 = vld [vmem:[#allocation5 + $0x30] ss:$20 sps:$4 sm:$0xff]   ;;  %v3980_v6 = vld [vmem:[#allocation5 + $0xc] ss:$20 sps:$4 sm:$0xff]  }
  0x5d   :  { %213 = vmatprep.subr.bf16.mxu0 %v3972_v1  ;;  %v3976_v3 = vld [vmem:[#allocation5 + $0x28] ss:$20 sps:$4 sm:$0xff]   ;;  %256 = vmatprep.subr.bf16.mxu1 %v3974_v2  ;;  %v3978_v5 = vld [vmem:[#allocation5 + $0x4] ss:$20 sps:$4 sm:$0xff]   ;;  %v3982_v7 = vld [vmem:[#allocation5] ss:$20 sps:$4 sm:$0xff]  }
  0x5e   :  { %214 = vmatpush1.bf16.msra.mxu0 %v3976_v3  ;;  %257 = vmatpush1.bf16.msra.mxu1 %v3977_v4  ;;  %v3983_v8 = vld [vmem:[#allocation5 + $0x8] ss:$20 sps:$4 sm:$0xff]   ;;  %vm197_vm0 = vcmask 261120   ;;  %v3984_v12 = vld [vmem:[#allocation5 + $0x38] ss:$20 sps:$4 sm:$0xff]   ;;  %v4512_v13 = vmov 0.0  }
  0x5f   :  { %215 = vmatprep.subr.bf16.mxu0 %v3978_v5  ;;  %v131_v10 = vld [vmem:[#allocation2 + $0x8] sm:$0xff]  ;;  %258 = vmatprep.subr.bf16.mxu1 %v3980_v6  ;;  %v3988_v14 = vld [vmem:[#allocation7 + $0x74] ss:$8 sps:$4 sm:$0xff]   ;;  %v3986_v15 = vld [vmem:[#allocation7 + $0x70] ss:$8 sps:$4 sm:$0xff]   ;;  %vm4513_vm1 = vmmov 0  }
  0x60   :  { %v132_v11 = vpack.c.bf16 %v131_v10, %v130_v9  ;;  %v3994_v16 = vld [vmem:[#allocation7 + $0x64] ss:$8 sps:$4 sm:$0xff]   ;;  %v3985_v17 = vld [vmem:[#allocation5 + $0x10] ss:$20 sps:$4 sm:$0xff]   ;;  %v3989_v21 = vld [vmem:[#allocation7 + $0x170] ss:$8 sps:$4 sm:$0xff]  }
  0x61   :  { %v3991_v18 = vld [vmem:[#allocation7 + $0x174] ss:$8 sps:$4 sm:$0xff]   ;;  %v3992_v19 = vld [vmem:[#allocation7 + $0x60] ss:$8 sps:$4 sm:$0xff]   ;;  %v3997_v22 = vld [vmem:[#allocation7 + $0x164] ss:$8 sps:$4 sm:$0xff]  }
  0x62   :  { %216 = vmatpush1.bf16.msra.mxu0 %v3982_v7  ;;  %259 = vmatpush1.bf16.msra.mxu1 %v3983_v8  ;;  %v4000_v20 = vld [vmem:[#allocation7 + $0x54] ss:$8 sps:$4 sm:$0xff]   ;;  %v3998_v23 = vld [vmem:[#allocation7 + $0x50] ss:$8 sps:$4 sm:$0xff]   ;;  %v4006_v24 = vld [vmem:[#allocation7 + $0x44] ss:$8 sps:$4 sm:$0xff]  }
  0x63   :  { %3792 = vmatprep.subr.bf16.mxu0 %v4512_v13  ;;  %775 = vmatprep.subr.bf16.mxu1 %v3988_v14  ;;  %v3995_v25 = vld [vmem:[#allocation7 + $0x160] ss:$8 sps:$4 sm:$0xff]   ;;  %v4003_v26 = vld [vmem:[#allocation7 + $0x154] ss:$8 sps:$4 sm:$0xff]   ;;  %v4001_v29 = vld [vmem:[#allocation7 + $0x150] ss:$8 sps:$4 sm:$0xff]  }
  0x64   :  { %v4004_v27 = vld [vmem:[#allocation7 + $0x40] ss:$8 sps:$4 sm:$0xff]   ;;  %v4012_v28 = vld [vmem:[#allocation7 + $0x34] ss:$8 sps:$4 sm:$0xff]   ;;  %v4009_v30 = vld [vmem:[#allocation7 + $0x144] ss:$8 sps:$4 sm:$0xff]  }
  0x65   :  { %3424 = vmatmul.mubr.msk.bf16.vlgmr.msra.gmra.mxu0 %vm197_vm0, %v132_v11  ;;  %3425 = vmatmul.mubr.msk.bf16.vlgmr.msra.gmra.mxu1 %vm197_vm0, %v132_v11  ;;  %v4010_v31 = vld [vmem:[#allocation7 + $0x30] ss:$8 sps:$4 sm:$0xff]   ;;  %v4018_v32 = vld [vmem:[#allocation7 + $0x24] ss:$8 sps:$4 sm:$0xff]   ;;  %v4007_v33 = vld [vmem:[#allocation7 + $0x140] ss:$8 sps:$4 sm:$0xff]  }
  0x66   :  { %3793 = vmatpush3.bf16.msra.mxu0 %v3984_v12  ;;  %3796 = vmatprep.mubr.msk.bf16.mxu0 %vm4513_vm1, %v4512_v13  ;;  %v4015_v34 = vld [vmem:[#allocation7 + $0x134] ss:$8 sps:$4 sm:$0xff]   ;;  %v4016_v35 = vld [vmem:[#allocation7 + $0x20] ss:$8 sps:$4 sm:$0xff]   ;;  %v4013_v37 = vld [vmem:[#allocation7 + $0x130] ss:$8 sps:$4 sm:$0xff]  }
  0x67   :  { %3794 = vmatprep.subr.bf16.mxu0 %v4512_v13  ;;  %776 = vmatpush1.bf16.msra.mxu1 %v3986_v15  ;;  %v4024_v36 = vld [vmem:[#allocation7 + $0x14] ss:$8 sps:$4 sm:$0xff]   ;;  %v4021_v38 = vld [vmem:[#allocation7 + $0x124] ss:$8 sps:$4 sm:$0xff]   ;;  %v4022_v39 = vld [vmem:[#allocation7 + $0x10] ss:$8 sps:$4 sm:$0xff]  }
  0x68   :  { %777 = vmatprep.subr.bf16.mxu1 %v3994_v16  ;;  %v4030_v40 = vld [vmem:[#allocation7 + $0x4] ss:$8 sps:$4 sm:$0xff]   ;;  %v4019_v41 = vld [vmem:[#allocation7 + $0x120] ss:$8 sps:$4 sm:$0xff]   ;;  %v4027_v42 = vld [vmem:[#allocation7 + $0x114] ss:$8 sps:$4 sm:$0xff]  }
  0x69   :  { %v4028_v43 = vld [vmem:[#allocation7] ss:$8 sps:$4 sm:$0xff]   ;;  %v4036_v44 = vld [vmem:[#allocation7 + $0xf4] ss:$8 sps:$4 sm:$0xff]   ;;  %v4025_v45 = vld [vmem:[#allocation7 + $0x110] ss:$8 sps:$4 sm:$0xff]  }
  0x6a   :  { %3795 = vmatpush3.bf16.msra.mxu0 %v3985_v17  ;;  %v4033_v46 = vld [vmem:[#allocation7 + $0x104] ss:$8 sps:$4 sm:$0xff]   ;;  %v4031_v47 = vld [vmem:[#allocation7 + $0x100] ss:$8 sps:$4 sm:$0xff]   ;;  %v4034_v48 = vld [vmem:[#allocation7 + $0xf0] ss:$8 sps:$4 sm:$0xff]  }
  0x6b   :  { %818 = vmatprep.subr.bf16.mxu0 %v3991_v18  ;;  %778 = vmatpush1.bf16.msra.mxu1 %v3992_v19  ;;  %v4042_v49 = vld [vmem:[#allocation7 + $0xe4] ss:$8 sps:$4 sm:$0xff]   ;;  %v4039_v50 = vld [vmem:[#allocation7 + $0x1f4] ss:$8 sps:$4 sm:$0xff]   ;;  %v4040_v51 = vld [vmem:[#allocation7 + $0xe0] ss:$8 sps:$4 sm:$0xff]   ;;  %v330_v18 = vlaneseq }
  0x6c   :  { %779 = vmatprep.subr.bf16.mxu1 %v4000_v20  ;;  %v4048_v52 = vld [vmem:[#allocation7 + $0xd4] ss:$8 sps:$4 sm:$0xff]   ;;  %v4037_v53 = vld [vmem:[#allocation7 + $0x1f0] ss:$8 sps:$4 sm:$0xff]   ;;  %v4045_v54 = vld [vmem:[#allocation7 + $0x1e4] ss:$8 sps:$4 sm:$0xff]  }
  0x6d   :  { %3797 = vmatmul.mubr.msk.bf16.vlgmr.msra.gmra.mxu0 %vm197_vm0, %v132_v11  ;;  %v4046_v55 = vld [vmem:[#allocation7 + $0xd0] ss:$8 sps:$4 sm:$0xff]   ;;  %v4054_v56 = vld [vmem:[#allocation7 + $0xc4] ss:$8 sps:$4 sm:$0xff]   ;;  %v4043_v57 = vld [vmem:[#allocation7 + $0x1e0] ss:$8 sps:$4 sm:$0xff]  }
  0x6e   :  { %819 = vmatpush1.bf16.msra.mxu0 %v3989_v21  ;;  %v4051_v58 = vld [vmem:[#allocation7 + $0x1d4] ss:$8 sps:$4 sm:$0xff]   ;;  %v4052_v59 = vld [vmem:[#allocation7 + $0xc0] ss:$8 sps:$4 sm:$0xff]   ;;  %v4049_v61 = vld [vmem:[#allocation7 + $0x1d0] ss:$8 sps:$4 sm:$0xff]  }
  0x6f   :  { %820 = vmatprep.subr.bf16.mxu0 %v3997_v22  ;;  %780 = vmatpush1.bf16.msra.mxu1 %v3998_v23  ;;  %v4060_v60 = vld [vmem:[#allocation7 + $0xb4] ss:$8 sps:$4 sm:$0xff]   ;;  %v4057_v62 = vld [vmem:[#allocation7 + $0x1c4] ss:$8 sps:$4 sm:$0xff]   ;;  %v4058_v63 = vld [vmem:[#allocation7 + $0xb0] ss:$8 sps:$4 sm:$0xff]  }
  0x70   :  { %781 = vmatprep.subr.bf16.mxu1 %v4006_v24  ;;  %v4055_v1 = vld [vmem:[#allocation7 + $0x1c0] ss:$8 sps:$4 sm:$0xff]   ;;  %v4063_v2 = vld [vmem:[#allocation7 + $0x1b4] ss:$8 sps:$4 sm:$0xff]   ;;  %v4061_v3 = vld [vmem:[#allocation7 + $0x1b0] ss:$8 sps:$4 sm:$0xff]  }
  0x71   :  { %v4066_v4 = vld [vmem:[#allocation7 + $0xa4] ss:$8 sps:$4 sm:$0xff]   ;;  %v4064_v6 = vld [vmem:[#allocation7 + $0xa0] ss:$8 sps:$4 sm:$0xff]   ;;  %v4072_v8 = vld [vmem:[#allocation7 + $0x94] ss:$8 sps:$4 sm:$0xff]  }
  0x72   :  { %821 = vmatpush1.bf16.msra.mxu0 %v3995_v25  ;;  %v4069_v5 = vld [vmem:[#allocation7 + $0x1a4] ss:$8 sps:$4 sm:$0xff]   ;;  %v4067_v7 = vld [vmem:[#allocation7 + $0x1a0] ss:$8 sps:$4 sm:$0xff]   ;;  %v4075_v9 = vld [vmem:[#allocation7 + $0x194] ss:$8 sps:$4 sm:$0xff]  }
  0x73   :  { %822 = vmatprep.subr.bf16.mxu0 %v4003_v26  ;;  %782 = vmatpush1.bf16.msra.mxu1 %v4004_v27  ;;  %v4070_v10 = vld [vmem:[#allocation7 + $0x90] ss:$8 sps:$4 sm:$0xff]   ;;  %v4078_v12 = vld [vmem:[#allocation7 + $0x84] ss:$8 sps:$4 sm:$0xff]   ;;  %v4076_v15 = vld [vmem:[#allocation7 + $0x80] ss:$8 sps:$4 sm:$0xff]  }
  0x74   :  { %783 = vmatprep.subr.bf16.mxu1 %v4012_v28  ;;  %v4073_v11 = vld [vmem:[#allocation7 + $0x190] ss:$8 sps:$4 sm:$0xff]   ;;  %v4081_v14 = vld [vmem:[#allocation7 + $0x184] ss:$8 sps:$4 sm:$0xff]   ;;  %v4079_v16 = vld [vmem:[#allocation7 + $0x180] ss:$8 sps:$4 sm:$0xff]  }
  0x75   :  { %v4082_v17 = vld [vmem:[%s5089_s3 + $0x78] sm:$0xff]   ;;  %v4616_v19 = vshrl.u32 %v330_v18, 7  ;;  %v328_v24 = vld [vmem:[#allocation13] sm:$0xf]  ;;  %vm1433_vm2 = vcmask 1043456   ;;  %vm1405_vm3 = vcmask 64512  }
  0x76   :  { %823 = vmatpush1.bf16.msra.mxu0 %v4001_v29  ;;  %v4108_v18 = vld [vmem:[%s5090_s4 + $0x7c] ss:$12 sps:$4 sm:$0xff]   ;;  %s4515_s17 = smov 32   ;;  %vm2221_vm4 = vcmask 523264   ;;  %vm2224_vm5 = vcmask 785408  }
  0x77   :  { %824 = vmatprep.subr.bf16.mxu0 %v4009_v30  ;;  %784 = vmatpush1.bf16.msra.mxu1 %v4010_v31  ;;  %v4619_v20 = vsub.s32 1, %v4616_v19  ;;  %v344_v21 = vsub.s32 3, %v4616_v19  ;;  %v4623_v22 = vsub.s32 0, %v4616_v19  ;;  %v4626_v23 = vsub.s32 2, %v4616_v19 }
  0x78   :  { %785 = vmatprep.subr.bf16.mxu1 %v4018_v32 }
  0x79   :  { %v337_v27 = vrot.slane %v328_v24, %v4619_v20  ;;  %v345_v28 = vrot.slane %v328_v24, %v344_v21  ;;  %v333_v29 = vrot.slane %v328_v24, %v4623_v22  ;;  %v341_v30 = vrot.slane %v328_v24, %v4626_v23  ;;  %v4106_v24 = vld [vmem:[%s5090_s4 + $0x78] ss:$12 sps:$4 sm:$0xff]  }
  0x7a   :  { %825 = vmatpush1.bf16.msra.mxu0 %v4007_v33 }
  0x7b   :  { %826 = vmatprep.subr.bf16.mxu0 %v4015_v34  ;;  %786 = vmatpush1.bf16.msra.mxu1 %v4016_v35 }
  0x7c   :  { %787 = vmatprep.subr.bf16.mxu1 %v4024_v36 }
  0x7e   :  { %827 = vmatpush1.bf16.msra.mxu0 %v4013_v37 }
  0x7f   :  { %828 = vmatprep.subr.bf16.mxu0 %v4021_v38  ;;  %788 = vmatpush1.bf16.msra.mxu1 %v4022_v39 }
  0x80   :  { %789 = vmatprep.subr.bf16.mxu1 %v4030_v40 }
  0x82   :  { %829 = vmatpush1.bf16.msra.mxu0 %v4019_v41 }
  0x83   :  { %830 = vmatprep.subr.bf16.mxu0 %v4027_v42  ;;  %790 = vmatpush1.bf16.msra.mxu1 %v4028_v43 }
  0x84   :  { %791 = vmatprep.subr.bf16.mxu1 %v4036_v44 }
  0x86   :  { %831 = vmatpush1.bf16.msra.mxu0 %v4025_v45 }
  0x87   :  { %832 = vmatprep.subr.bf16.mxu0 %v4033_v46  ;;  %792 = vmatpush2.bf16.msra.mxu1 %v4034_v48 }
  0x88   :  { %793 = vmatprep.subr.bf16.mxu1 %v4042_v49 }
  0x8a   :  { %833 = vmatpush1.bf16.msra.mxu0 %v4031_v47 }
  0x8b   :  { %834 = vmatprep.subr.bf16.mxu0 %v4039_v50  ;;  %794 = vmatpush2.bf16.msra.mxu1 %v4040_v51 }
  0x8c   :  { %795 = vmatprep.subr.bf16.mxu1 %v4048_v52 }
  0x8e   :  { %835 = vmatpush2.bf16.msra.mxu0 %v4037_v53 }
  0x8f   :  { %836 = vmatprep.subr.bf16.mxu0 %v4045_v54  ;;  %796 = vmatpush2.bf16.msra.mxu1 %v4046_v55 }
  0x90   :  { %797 = vmatprep.subr.bf16.mxu1 %v4054_v56 }
  0x92   :  { %837 = vmatpush2.bf16.msra.mxu0 %v4043_v57  ;;  %v4083_v57 = vld [vmem:[%s5089_s3 + $0x38] sm:$0xff]  }
  0x93   :  { %838 = vmatprep.subr.bf16.mxu0 %v4051_v58  ;;  %798 = vmatpush2.bf16.msra.mxu1 %v4052_v59 }
  0x94   :  { %799 = vmatprep.subr.bf16.mxu1 %v4060_v60 }
  0x96   :  { %839 = vmatpush2.bf16.msra.mxu0 %v4049_v61  ;;  %v4084_v61 = vld [vmem:[%s5089_s3 + $0x70] sm:$0xff]  }
  0x97   :  { %840 = vmatprep.subr.bf16.mxu0 %v4057_v62  ;;  %800 = vmatpush2.bf16.msra.mxu1 %v4058_v63  ;;  %v4085_v63 = vld [vmem:[%s5089_s3 + $0x30] sm:$0xff]  }
  0x98   :  { %801 = vmatprep.subr.bf16.mxu1 %v4066_v4  ;;  %v4089_v4 = vld [vmem:[%s5089_s3 + $0x20] sm:$0xff]  }
  0x9a   :  { %841 = vmatpush2.bf16.msra.mxu0 %v4055_v1  ;;  %v4086_v1 = vld [vmem:[%s5089_s3 + $0x68] sm:$0xff]  }
  0x9b   :  { %842 = vmatprep.subr.bf16.mxu0 %v4063_v2  ;;  %802 = vmatpush2.bf16.msra.mxu1 %v4064_v6  ;;  %v4087_v2 = vld [vmem:[%s5089_s3 + $0x28] sm:$0xff]   ;;  %v4091_v6 = vld [vmem:[%s5089_s3 + $0x18] sm:$0xff]  }
  0x9c   :  { %803 = vmatprep.subr.bf16.mxu1 %v4072_v8  ;;  %v4093_v8 = vld [vmem:[%s5089_s3 + $0x10] sm:$0xff]  }
  0x9e   :  { %843 = vmatpush2.bf16.msra.mxu0 %v4061_v3  ;;  %v4088_v3 = vld [vmem:[%s5089_s3 + $0x60] sm:$0xff]  }
  0x9f   :  { %844 = vmatprep.subr.bf16.mxu0 %v4069_v5  ;;  %804 = vmatpush2.bf16.msra.mxu1 %v4070_v10  ;;  %v4090_v5 = vld [vmem:[%s5089_s3 + $0x58] sm:$0xff]   ;;  %v4095_v10 = vld [vmem:[%s5089_s3 + $0x8] sm:$0xff]  }
  0xa0   :  { %805 = vmatprep.subr.bf16.mxu1 %v4078_v12  ;;  %v4097_v12 = vld [vmem:[%s5089_s3] sm:$0xff]  }
  0xa2   :  { %845 = vmatpush2.bf16.msra.mxu0 %v4067_v7  ;;  %v4092_v7 = vld [vmem:[%s5089_s3 + $0x50] sm:$0xff]  }
  0xa3   :  { %846 = vmatprep.subr.bf16.mxu0 %v4075_v9  ;;  %806 = vmatpush2.bf16.msra.mxu1 %v4076_v15  ;;  %v4094_v9 = vld [vmem:[%s5089_s3 + $0x48] sm:$0xff]  }
  0xa4   :  { %3676 = vmatprep.subr.bf16.mxu1 %v4082_v17  ;;  %v4100_v15 = vld [vmem:[%s5090_s4 + $0xac] ss:$12 sps:$4 sm:$0xff]   ;;  %v4102_v17 = vld [vmem:[%s5090_s4 + $0x90] ss:$12 sps:$4 sm:$0xff]  }
  0xa6   :  { %847 = vmatpush2.bf16.msra.mxu0 %v4073_v11  ;;  %v4096_v11 = vld [vmem:[%s5089_s3 + $0x40] sm:$0xff]  }
  0xa7   :  { %848 = vmatprep.subr.bf16.mxu0 %v4081_v14  ;;  %v4098_v14 = vld [vmem:[%s5090_s4 + $0xa8] ss:$12 sps:$4 sm:$0xff]  }
  0xaa   :  { %849 = vmatpush2.bf16.msra.mxu0 %v4079_v16  ;;  %v4104_v16 = vld [vmem:[%s5090_s4 + $0x94] ss:$12 sps:$4 sm:$0xff]  }
  0xab   :  { %1221 = vmatprep.subr.bf16.mxu0 %v4100_v15 }
 0x125   :  { %v235_v25 = vpop.f32.mrf.mxu0  ;;  %v278_v26 = vpop.f32.mrf.mxu1 }
 0x126   :  { %v350_v39 = vadd.f32 %v333_v29, %v235_v25  ;;  %v352_v40 = vadd.f32 %v341_v30, %v278_v26  ;;  %v4112_v25 = vld [vmem:[%s5090_s4 + $0x64] ss:$12 sps:$4 sm:$0xff]   ;;  %v4110_v26 = vld [vmem:[%s5090_s4 + $0x60] ss:$12 sps:$4 sm:$0xff]  }
 0x127   :  { %v237_v31 = vpop.f32.mrf.mxu0  ;;  %v280_v32 = vpop.f32.mrf.mxu1 }
 0x128   :  { %v351_v35 = vadd.f32 %v337_v27, %v237_v31  ;;  %v353_v36 = vadd.f32 %v345_v28, %v280_v32  ;;  %v358_v52 = vmax.f32 %v350_v39, 0.0  ;;  %v360_v53 = vmax.f32 %v352_v40, 0.0 }
 0x129   :  { %v239_v33 = vpop.f32.mrf.mxu0  ;;  %v282_v34 = vpop.f32.mrf.mxu1 }
 0x12a   :  { %v354_v37 = vadd.f32 %v333_v29, %v239_v33  ;;  %v356_v38 = vadd.f32 %v341_v30, %v282_v34  ;;  %v359_v48 = vmax.f32 %v351_v35, 0.0  ;;  %v361_v49 = vmax.f32 %v353_v36, 0.0  ;;  %v443_v29 = vld [vmem:[#allocation13 + $0x4] sm:$0x3] }
 0x12b   :  { %v241_v41 = vpop.f32.mrf.mxu0  ;;  %v284_v42 = vpop.f32.mrf.mxu1  ;;  %v452_v30 = vrot.slane %v443_v29, %v4619_v20  ;;  %v448_v31 = vrot.slane %v443_v29, %v4623_v22 }
 0x12c   :  { %v355_v43 = vadd.f32 %v337_v27, %v241_v41  ;;  %v357_v44 = vadd.f32 %v345_v28, %v284_v42  ;;  %v362_v45 = vmax.f32 %v354_v37, 0.0  ;;  %v364_v46 = vmax.f32 %v356_v38, 0.0  ;;  %v4116_v27 = vld [vmem:[%s5090_s4 + $0x4c] ss:$12 sps:$4 sm:$0xff]   ;;  %v4114_v28 = vld [vmem:[%s5090_s4 + $0x48] ss:$12 sps:$4 sm:$0xff]  }
 0x12d   :  { %v4633_v47 = vpop.f32.mrf.mxu0 }
 0x12e   :  { %v363_v50 = vmax.f32 %v355_v43, 0.0  ;;  %v365_v51 = vmax.f32 %v357_v44, 0.0  ;;  %v375_v58 = vpack.c.bf16 %v362_v45, %v358_v52  ;;  %v377_v59 = vpack.c.bf16 %v364_v46, %v360_v53 }
 0x12f   :  { %v3798_v54 = vpop.f32.mrf.mxu0 }
 0x130   :  { %v376_v55 = vpack.c.bf16 %v363_v50, %v359_v48  ;;  %v378_v56 = vpack.c.bf16 %v365_v51, %v361_v49  ;;  %v4101_v54 = vld [vmem:[%s5090_s4 + $0xb0] ss:$12 sps:$4 sm:$0xff]  }
 0x131   :  { %v4638_v60 = vpop.f32.mrf.mxu0 }
 0x132   :  { %807 = vmatprep.mubr.bf16.mxu1 %v376_v55  ;;  %850 = vmatprep.mubr.bf16.mxu0 %v378_v56  ;;  %v4105_v56 = vld [vmem:[%s5090_s4 + $0x98] ss:$12 sps:$4 sm:$0xff]  }
 0x133   :  { %808 = vmatmul.mubr.bf16.vlgmr.msra.gmra.mxu1 %v375_v58  ;;  %851 = vmatmul.mubr.bf16.vlgmr.msra.gmra.mxu0 %v377_v59  ;;  %v3799_v62 = vpop.f32.mrf.mxu0  ;;  %v4113_v58 = vld [vmem:[%s5090_s4 + $0x68] ss:$12 sps:$4 sm:$0xff]   ;;  %v4117_v59 = vld [vmem:[%s5090_s4 + $0x50] ss:$12 sps:$4 sm:$0xff]  }
 0x134   :  { %3677 = vmatpush3.bf16.msra.mxu1 %v4083_v57  ;;  %1253 = vmatprep.mubr.bf16.mxu0 %v4511_v0  ;;  %v4109_v57 = vld [vmem:[%s5090_s4 + $0x80] ss:$12 sps:$4 sm:$0xff]   ;;  %v4118_v62 = vld [vmem:[%s5090_s4 + $0x30] ss:$12 sps:$4 sm:$0xff]  }
 0x135   :  { %3678 = vmatprep.subr.bf16.mxu1 %v4084_v61  ;;  %1222 = vmatpush1.bf16.msra.mxu0 %v4098_v14  ;;  %v4120_v61 = vld [vmem:[%s5090_s4 + $0x34] ss:$12 sps:$4 sm:$0xff]  }
 0x136   :  { %1223 = vmatprep.subr.bf16.mxu0 %v4104_v16 }
 0x138   :  { %3679 = vmatpush3.bf16.msra.mxu1 %v4085_v63  ;;  %v4121_v63 = vld [vmem:[%s5090_s4 + $0x38] ss:$12 sps:$4 sm:$0xff]  }
 0x139   :  { %3680 = vmatprep.subr.bf16.mxu1 %v4086_v1  ;;  %1224 = vmatpush1.bf16.msra.mxu0 %v4102_v17  ;;  %v4124_v1 = vld [vmem:[%s5090_s4 + $0x1c] ss:$12 sps:$4 sm:$0xff]  }
 0x13a   :  { %1225 = vmatprep.subr.bf16.mxu0 %v4108_v18  ;;  %v1076_v18 = vld [vmem:[#allocation13 + $0x7] sm:$0x7] }
 0x13b   :  { %v1089_v29 = vrot.slane %v1076_v18, %v4626_v23 }
 0x13c   :  { %3681 = vmatpush3.bf16.msra.mxu1 %v4087_v2  ;;  %v4122_v2 = vld [vmem:[%s5090_s4 + $0x18] ss:$12 sps:$4 sm:$0xff]  }
 0x13d   :  { %3682 = vmatprep.subr.bf16.mxu1 %v4088_v3  ;;  %1226 = vmatpush1.bf16.msra.mxu0 %v4106_v24  ;;  %v4125_v3 = vld [vmem:[%s5090_s4 + $0x20] ss:$12 sps:$4 sm:$0xff]   ;;  %v1085_v24 = vrot.slane %v1076_v18, %v4619_v20 }
 0x13e   :  { %1227 = vmatprep.subr.bf16.mxu0 %v4112_v25 }
 0x140   :  { %3683 = vmatpush3.bf16.msra.mxu1 %v4089_v4  ;;  %v4128_v4 = vld [vmem:[%s5090_s4 + $0x4] ss:$12 sps:$4 sm:$0xff]  }
 0x141   :  { %3684 = vmatprep.subr.bf16.mxu1 %v4090_v5  ;;  %1228 = vmatpush1.bf16.msra.mxu0 %v4110_v26  ;;  %v4126_v5 = vld [vmem:[%s5090_s4] ss:$12 sps:$4 sm:$0xff]  }
 0x142   :  { %1229 = vmatprep.subr.bf16.mxu0 %v4116_v27 }
 0x144   :  { %3685 = vmatpush3.bf16.msra.mxu1 %v4091_v6  ;;  %v4129_v6 = vld [vmem:[%s5090_s4 + $0x8] ss:$12 sps:$4 sm:$0xff]   ;;  %s4514_s4 = smov 96  }
 0x145   :  { %3686 = vmatprep.subr.bf16.mxu1 %v4092_v7  ;;  %1230 = vmatpush1.bf16.msra.mxu0 %v4114_v28 }
 0x146   :  { %1231 = vmatprep.subr.bf16.mxu0 %v4120_v61 }
 0x148   :  { %3687 = vmatpush3.bf16.msra.mxu1 %v4093_v8 }
 0x149   :  { %3688 = vmatprep.subr.bf16.mxu1 %v4094_v9  ;;  %1232 = vmatpush1.bf16.msra.mxu0 %v4118_v62 }
 0x14a   :  { %1233 = vmatprep.subr.bf16.mxu0 %v4124_v1 }
 0x14c   :  { %3689 = vmatpush3.bf16.msra.mxu1 %v4095_v10 }
 0x14d   :  { %3690 = vmatprep.subr.bf16.mxu1 %v4096_v11  ;;  %1234 = vmatpush1.bf16.msra.mxu0 %v4122_v2  ;;  %v3492_v11 = vld [vmem:[#allocation13 + $0x6] ss:$0 sm:$0xff] }
 0x14e   :  { %1235 = vmatprep.subr.bf16.mxu0 %v4128_v4 }
 0x150   :  { %3691 = vmatpush3.bf16.msra.mxu1 %v4097_v12 }
 0x151   :  { %3800 = vmatprep.subr.bf16.mxu1 %v4512_v13  ;;  %1236 = vmatpush1.bf16.msra.mxu0 %v4126_v5 }
 0x152   :  { %3820 = vmatprep.subr.bf16.mxu0 %v4512_v13 }
 0x1f3   :  { %v809_v32 = vpop.f32.mrf.mxu1  ;;  %v852_v33 = vpop.f32.mrf.mxu0 }
 0x1f4   :  { %v810_v37 = vadd.f32 %v809_v32, %v448_v31 }
 0x1f5   :  { %v811_v34 = vpop.f32.mrf.mxu1  ;;  %v854_v35 = vpop.f32.mrf.mxu0 }
 0x1f6   :  { %v812_v36 = vadd.f32 %v811_v34, %v452_v30  ;;  %v853_v45 = vadd.f32 %v852_v33, %v810_v37  ;;  %v1081_v33 = vrot.slane %v1076_v18, %v4623_v22 }
 0x1f7   :  { %v813_v38 = vpop.f32.mrf.mxu1  ;;  %v856_v39 = vpop.f32.mrf.mxu0 }
 0x1f8   :  { %v814_v40 = vadd.f32 %v813_v38, %v448_v31  ;;  %v855_v42 = vadd.f32 %v854_v35, %v812_v36  ;;  %v861_v52 = vmax.f32 %v853_v45, 0.0 }
 0x1f9   :  { %v815_v41 = vpop.f32.mrf.mxu1  ;;  %v858_v46 = vpop.f32.mrf.mxu0 }
 0x1fa   :  { %v857_v43 = vadd.f32 %v856_v39, %v814_v40  ;;  %v816_v44 = vadd.f32 %v815_v41, %v452_v30  ;;  %v862_v50 = vmax.f32 %v855_v42, 0.0 }
 0x1fc   :  { %v859_v48 = vadd.f32 %v858_v46, %v816_v44  ;;  %v863_v49 = vmax.f32 %v857_v43, 0.0 }
 0x1fe   :  { %v864_v51 = vmax.f32 %v859_v48, 0.0  ;;  %v865_v55 = vpack.c.bf16 %v863_v49, %v861_v52 }
 0x200   :  { %v866_v53 = vpack.c.bf16 %v864_v51, %v862_v50 }
 0x202   :  { %1034 = vmatprep.mubr.bf16.mxu1 %v866_v53 }
 0x203   :  { %1035 = vmatmul.mubr.bf16.vlgmr.msra.gmra.mxu1 %v865_v55 }
 0x204   :  { %3801 = vmatpush3.bf16.msra.mxu1 %v4101_v54  ;;  %3816 = vmatprep.mubr.msk.bf16.mxu1 %vm4513_vm1, %v4512_v13 }
 0x205   :  { %3802 = vmatprep.subr.bf16.mxu1 %v4512_v13 }
 0x208   :  { %3803 = vmatpush3.bf16.msra.mxu1 %v4105_v56 }
 0x209   :  { %3804 = vmatprep.subr.bf16.mxu1 %v4512_v13 }
 0x20c   :  { %3805 = vmatpush3.bf16.msra.mxu1 %v4109_v57 }
 0x20d   :  { %3806 = vmatprep.subr.bf16.mxu1 %v4512_v13 }
 0x210   :  { %3807 = vmatpush3.bf16.msra.mxu1 %v4113_v58 }
 0x211   :  { %3808 = vmatprep.subr.bf16.mxu1 %v4512_v13 }
 0x214   :  { %3809 = vmatpush3.bf16.msra.mxu1 %v4117_v59 }
 0x215   :  { %3810 = vmatprep.subr.bf16.mxu1 %v4512_v13 }
 0x218   :  { %3811 = vmatpush3.bf16.msra.mxu1 %v4121_v63 }
 0x219   :  { %3812 = vmatprep.subr.bf16.mxu1 %v4512_v13 }
 0x21c   :  { %3813 = vmatpush3.bf16.msra.mxu1 %v4125_v3 }
 0x21d   :  { %3814 = vmatprep.subr.bf16.mxu1 %v4512_v13 }
 0x220   :  { %3815 = vmatpush3.bf16.msra.mxu1 %v4129_v6 }
 0x221   :  { %3844 = vmatprep.subr.bf16.mxu1 %v4512_v13 }
 0x2c3   :  { %v3692_v7 = vpop.f32.mrf.mxu1 }
 0x2c5   :  { %v3693_v8 = vpop.f32.mrf.mxu1 }
 0x2c6   :  { %v3694_v10 = vadd.f32 %v3693_v8, %v3692_v7 }
 0x2c7   :  { %v3695_v9 = vpop.f32.mrf.mxu1 }
 0x2c8   :  { %v4769_v15 = vadd.f32 %v3694_v10, %v3492_v11 }
 0x2c9   :  { %v3696_v12 = vpop.f32.mrf.mxu1 }
 0x2ca   :  { %v3697_v14 = vadd.f32 %v3696_v12, %v3695_v9 }
 0x2cc   :  { %v4771_v16 = vadd.f32 %v3697_v14, %v3492_v11 }
 0x2ce   :  { %v1043_v17 = vpack.c.bf16 %v4771_v16, %v4769_v15 }
 0x2d0   :  { %1254 = vmatmul.mubr.bf16.vlgmr.msra.gmra.mxu0 %v1043_v17  ;;  %3817 = vmatmul.mubr.bf16.vlgmr.msra.gmra.mxu1 %v1043_v17 }
 0x2d1   :  { %3822 = vmatprep.mubr.msk.bf16.mxu0 %vm4513_vm1, %v4512_v13  ;;  %3846 = vmatprep.mubr.msk.bf16.mxu1 %vm4513_vm1, %v4512_v13 }
 0x390   :  { %v1255_v25 = vpop.f32.mrf.mxu0  ;;  %v1298_v26 = vpop.f32.mrf.mxu1 }
 0x391   :  { %v1256_v40 = vadd.f32 %v1255_v25, %v1081_v33  ;;  %v1299_v43 = vadd.f32 %v1298_v26, %v1089_v29 }
 0x392   :  { %v1257_v27 = vpop.f32.mrf.mxu0  ;;  %v3818_v28 = vpop.f32.mrf.mxu1 }
 0x393   :  { %v1258_v30 = vadd.f32 %v1257_v27, %v1085_v24  ;;  %v4791_v42 = vpack.c.bf16 %v1256_v40, %v1256_v40  ;;  %v4800_v46 = vpack.c.bf16 %v1299_v43, %v1299_v43 }
 0x394   :  { %v1259_v31 = vpop.f32.mrf.mxu0  ;;  %v1301_v32 = vpop.f32.mrf.mxu1 }
 0x395   :  { %v4782_v34 = vpack.c.bf16 %v1258_v30, %v1258_v30  ;;  %v4784_v35 = vadd.f32 %v1301_v32, %v1089_v29  ;;  %v1260_v45 = vadd.f32 %v1259_v31, %v1081_v33  ;;  %v1435_v49 = vsel %vm1433_vm2, %v4800_v46, 0 }
 0x396   :  { %v1261_v36 = vpop.f32.mrf.mxu0  ;;  %v3819_v37 = vpop.f32.mrf.mxu1 }
 0x397   :  { %v1262_v38 = vadd.f32 %v1261_v36, %v1085_v24  ;;  %v1315_v39 = vsel %vm197_vm0, %v4782_v34, 0  ;;  %v4802_v48 = vpack.c.bf16 %v1260_v45, %v1260_v45  ;;  %v4827_v17 = vpack.c.bf16 %v4784_v35, %v4784_v35 }
 0x398   :  { %3821 = vmatpush3.bf16.xpose.msra.mxu0 %v1315_v39 }
 0x399   :  { %3826 = vmatprep.subr.bf16.mxu0 %v4512_v13  ;;  %v4789_v41 = vpack.c.bf16 %v1262_v38, %v1262_v38  ;;  %v1481_v25 = vsel %vm1433_vm2, %v4827_v17, 0 }
 0x39b   :  { %v1361_v44 = vsel %vm197_vm0, %v4789_v41, 0 }
 0x39f   :  { %3823 = vmatmul.mubr.msk.bf16.vlgmr.msra.gmra.mxu0 %vm197_vm0, %v4791_v42 }
 0x3a0   :  { %3827 = vmatpush3.bf16.xpose.msra.mxu0 %v1361_v44  ;;  %3828 = vmatprep.mubr.msk.bf16.mxu0 %vm4513_vm1, %v4512_v13 }
 0x3a1   :  { %3832 = vmatprep.subr.bf16.mxu0 %v4512_v13 }
 0x3a7   :  { %3829 = vmatmul.mubr.msk.bf16.vlgmr.msra.gmra.mxu0 %vm197_vm0, %v4802_v48 }
 0x3a8   :  { %3833 = vmatpush3.bf16.msra.mxu0 %v1435_v49  ;;  %3834 = vmatprep.mubr.msk.bf16.mxu0 %vm4513_vm1, %v4512_v13 }
 0x3a9   :  { %3838 = vmatprep.subr.bf16.mxu0 %v4512_v13 }
 0x45f   :  { %v1351_v50 = vpop.f32.mrf.mxu0 }
 0x460   :  { %v1403_v51 = vmul.f32 0.17677669, %v1351_v50 }
 0x461   :  { %v3824_v52 = vpop.f32.mrf.mxu0 }
 0x462   :  { %v1406_v53 = vsel %vm1405_vm3, %v1403_v51, -inf }
 0x463   :  { %1407 = vmax.xlane.f32.xlu0 %v1406_v53  ;;  %v1354_v54 = vpop.f32.mrf.mxu0 }
 0x465   :  { %v3825_v55 = vpop.f32.mrf.mxu0 }
 0x467   :  { %v1397_v56 = vpop.f32.mrf.mxu0 }
 0x468   :  { %v1404_v57 = vmul.f32 0.17677669, %v1397_v56 }
 0x469   :  { %v3830_v58 = vpop.f32.mrf.mxu0 }
 0x46a   :  { %v1409_v59 = vsel %vm1405_vm3, %v1404_v57, -inf }
 0x46b   :  { %1410 = vmax.xlane.f32.xlu0 %v1409_v59  ;;  %v1400_v61 = vpop.f32.mrf.mxu0 }
 0x46d   :  { %v3831_v62 = vpop.f32.mrf.mxu0 }
 0x481   :  { %1527 = vrot.lane.b32.xlu0 %v4782_v34, %s4514_s4 }
 0x4ec   :  { %v1408_v63 = vpop.xlane.xlu0 %1407 }
 0x4ed   :  { %v1412_v1 = vsub.f32 %v1403_v51, %v1408_v63 }
 0x4ef   :  { %v1414_v2 = vmul.f32 1.442695, %v1412_v1 }
 0x4f1   :  { %4290 = vpow2.f32 %v1414_v2 }
 0x4f4   :  { %v1411_v3 = vpop.xlane.xlu0 %1410 }
 0x4f5   :  { %v1413_v8 = vsub.f32 %v1404_v57, %v1411_v3 }
 0x4f7   :  { %v1416_v9 = vmul.f32 1.442695, %v1413_v8 }
 0x4f8   :  { %v1528_v4 = vpop.permute.xlu0 %1527 }
 0x4f9   :  { %v1533_v5 = vsel %vm197_vm0, %v1528_v4, 0  ;;  %4292 = vpow2.f32 %v1416_v9 }
 0x4fa   :  { %3845 = vmatpush3.bf16.xpose.msra.mxu1 %v1533_v5 }
 0x4fb   :  { %3856 = vmatprep.subr.bf16.mxu1 %v4512_v13 }
 0x4fe   :  { %v4291_v6 = vpop.eup %4290 }
 0x4ff   :  { %v1418_v7 = vsel %vm1405_vm3, %v4291_v6, 0.0 }
 0x500   :  { %1419 = vadd.xlane.f32.xlu1 %v1418_v7 }
 0x506   :  { %v4293_v10 = vpop.eup %4292 }
 0x507   :  { %v1421_v11 = vsel %vm1405_vm3, %v4293_v10, 0.0 }
 0x511   :  { %1579 = vrot.lane.b32.xlu1 %v4789_v41, %s4514_s4 }
 0x535   :  { %1422 = vadd.xlane.f32.xlu1 %v1421_v11 }
 0x546   :  { %1524 = vrot.lane.b32.xlu1 %v4791_v42, %s4514_s4 }
 0x54a   :  { %1576 = vrot.lane.b32.xlu1 %v4802_v48, %s4514_s4 }
 0x589   :  { %v1420_v12 = vpop.xlane.xlu1 %1419 }
 0x58a   :  { %4294 = vrcp.f32 %v1420_v12 }
 0x58d   :  { %v1580_v26 = vpop.permute.xlu1 %1579 }
 0x58e   :  { %v1585_v32 = vsel %vm197_vm0, %v1580_v26, 0 }
 0x597   :  { %v4295_v14 = vpop.eup %4294 }
 0x598   :  { %v1425_v18 = vmul.f32 %v4295_v14, %v4291_v6 }
 0x59a   :  { %v1428_v24 = vpack.c.bf16 %v1425_v18, %v1425_v18 }
 0x59c   :  { %3835 = vmatmul.mubr.msk.bf16.vlgmr.msra.gmra.mxu0 %vm1405_vm3, %v1428_v24 }
 0x59d   :  { %3839 = vmatpush3.bf16.msra.mxu0 %v1481_v25  ;;  %3840 = vmatprep.mubr.msk.bf16.mxu0 %vm4513_vm1, %v4512_v13 }
 0x59e   :  { %3850 = vmatprep.subr.bf16.mxu0 %v4512_v13 }
 0x5be   :  { %v1423_v27 = vpop.xlane.xlu1 %1422 }
 0x5bf   :  { %4296 = vrcp.f32 %v1423_v27 }
 0x5c2   :  { %v1525_v28 = vpop.permute.xlu1 %1524 }
 0x5c3   :  { %3847 = vmatmul.mubr.msk.bf16.vlgmr.msra.gmra.mxu1 %vm197_vm0, %v1525_v28 }
 0x5c4   :  { %3858 = vmatprep.mubr.msk.bf16.mxu1 %vm4513_vm1, %v4512_v13 }
 0x5c6   :  { %v1577_v33 = vpop.permute.xlu1 %1576 }
 0x5cc   :  { %v4297_v29 = vpop.eup %4296 }
 0x5cd   :  { %v1427_v30 = vmul.f32 %v4297_v29, %v4293_v10 }
 0x5cf   :  { %v1429_v31 = vpack.c.bf16 %v1427_v30, %v1427_v30 }
 0x5d1   :  { %3841 = vmatmul.mubr.msk.bf16.vlgmr.msra.gmra.mxu0 %vm1405_vm3, %v1429_v31 }
 0x5d2   :  { %3851 = vmatpush3.bf16.xpose.msra.mxu0 %v1585_v32  ;;  %3852 = vmatprep.mubr.msk.bf16.mxu0 %vm4513_vm1, %v4512_v13 }
 0x5d3   :  { %3862 = vmatprep.subr.bf16.mxu0 %v4512_v13 }
 0x5d9   :  { %3853 = vmatmul.mubr.msk.bf16.vlgmr.msra.gmra.mxu0 %vm197_vm0, %v1577_v33 }
 0x5da   :  { %3864 = vmatprep.mubr.msk.bf16.mxu0 %vm4513_vm1, %v4512_v13 }
 0x65c   :  { %v4846_v35 = vpop.f32.mrf.mxu0 }
 0x65e   :  { %v3836_v36 = vpop.f32.mrf.mxu0 }
 0x660   :  { %v1474_v37 = vpop.f32.mrf.mxu0 }
 0x662   :  { %v3837_v38 = vpop.f32.mrf.mxu0 }
 0x683   :  { %v1569_v39 = vpop.f32.mrf.mxu1 }
 0x684   :  { %v1627_v40 = vmul.f32 0.17677669, %v1569_v39 }
 0x685   :  { %v3848_v43 = vpop.f32.mrf.mxu1 }
 0x686   :  { %v1629_v44 = vsel %vm1405_vm3, %v1627_v40, -inf }
 0x687   :  { %1630 = vmax.xlane.f32.xlu0 %v1629_v44  ;;  %v1572_v45 = vpop.f32.mrf.mxu1 }
 0x689   :  { %v3849_v49 = vpop.f32.mrf.mxu1 }
 0x691   :  { %v4849_v50 = vpop.f32.mrf.mxu0 }
 0x693   :  { %v3842_v51 = vpop.f32.mrf.mxu0 }
 0x695   :  { %v1520_v52 = vpop.f32.mrf.mxu0 }
 0x697   :  { %v3843_v53 = vpop.f32.mrf.mxu0 }
 0x699   :  { %v1621_v54 = vpop.f32.mrf.mxu0 }
 0x69a   :  { %v1628_v55 = vmul.f32 0.17677669, %v1621_v54 }
 0x69b   :  { %v3854_v56 = vpop.f32.mrf.mxu0 }
 0x69c   :  { %v1632_v57 = vsel %vm1405_vm3, %v1628_v55, -inf }
 0x69d   :  { %1633 = vmax.xlane.f32.xlu1 %v1632_v57  ;;  %v1624_v58 = vpop.f32.mrf.mxu0 }
 0x69f   :  { %v3855_v59 = vpop.f32.mrf.mxu0 }
 0x6ae   :  { %1703 = vrot.lane.b32.xlu1 %v4827_v17, %s4514_s4 }
 0x6b2   :  { %1753 = vrot.lane.b32.xlu1 %v4782_v34, %s4500_s23 }
 0x6b6   :  { %1803 = vrot.lane.b32.xlu1 %v4789_v41, %s4500_s23 }
 0x6ba   :  { %1801 = vrot.lane.b32.xlu1 %v4802_v48, %s4500_s23 }
 0x710   :  { %v1631_v61 = vpop.xlane.xlu0 %1630 }
 0x711   :  { %v1635_v62 = vsub.f32 %v1627_v40, %v1631_v61 }
 0x713   :  { %v1637_v63 = vmul.f32 1.442695, %v1635_v62 }
 0x715   :  { %4298 = vpow2.f32 %v1637_v63 }
 0x722   :  { %v4299_v1 = vpop.eup %4298 }
 0x723   :  { %v1641_v2 = vsel %vm1405_vm3, %v4299_v1, 0.0 }
 0x724   :  { %1642 = vadd.xlane.f32.xlu0 %v1641_v2 }
 0x726   :  { %v1634_v3 = vpop.xlane.xlu1 %1633 }
 0x727   :  { %v1636_v4 = vsub.f32 %v1628_v55, %v1634_v3 }
 0x729   :  { %v1639_v5 = vmul.f32 1.442695, %v1636_v4 }
 0x72a   :  { %v1704_v6 = vpop.permute.xlu1 %1703 }
 0x72b   :  { %4300 = vpow2.f32 %v1639_v5  ;;  %v1709_v7 = vsel %vm1433_vm2, %v1704_v6, 0 }
 0x72c   :  { %3863 = vmatpush3.bf16.msra.mxu0 %v1709_v7 }
 0x72d   :  { %3874 = vmatprep.subr.bf16.mxu0 %v4512_v13 }
 0x72e   :  { %v1754_v25 = vpop.permute.xlu1 %1753 }
 0x72f   :  { %v1759_v27 = vsel %vm197_vm0, %v1754_v25, 0 }
 0x732   :  { %v1804_v30 = vpop.permute.xlu1 %1803 }
 0x733   :  { %v1809_v33 = vsel %vm197_vm0, %v1804_v30, 0 }
 0x736   :  { %v1802_v36 = vpop.permute.xlu1 %1801 }
 0x738   :  { %v4301_v8 = vpop.eup %4300 }
 0x739   :  { %v1644_v9 = vsel %vm1405_vm3, %v4301_v8, 0.0 }
 0x73a   :  { %1645 = vadd.xlane.f32.xlu0 %v1644_v9 }
 0x750   :  { %1654 = vrot.lane.b32.xlu0 %v4800_v46, %s4514_s4 }
 0x754   :  { %1751 = vrot.lane.b32.xlu0 %v4791_v42, %s4500_s23 }
 0x7ad   :  { %v1643_v10 = vpop.xlane.xlu0 %1642 }
 0x7ae   :  { %4302 = vrcp.f32 %v1643_v10 }
 0x7bb   :  { %v4303_v11 = vpop.eup %4302 }
 0x7bc   :  { %v1648_v14 = vmul.f32 %v4303_v11, %v4299_v1 }
 0x7be   :  { %v1651_v26 = vpack.c.bf16 %v1648_v14, %v1648_v14 }
 0x7c3   :  { %v1646_v12 = vpop.xlane.xlu0 %1645 }
 0x7c4   :  { %4304 = vrcp.f32 %v1646_v12 }
 0x7c7   :  { %v1655_v18 = vpop.permute.xlu0 %1654 }
 0x7c8   :  { %v1660_v24 = vsel %vm1433_vm2, %v1655_v18, 0 }
 0x7c9   :  { %3857 = vmatpush3.bf16.msra.mxu1 %v1660_v24 }
 0x7ca   :  { %3868 = vmatprep.subr.bf16.mxu1 %v4512_v13 }
 0x7cb   :  { %v1752_v31 = vpop.permute.xlu0 %1751 }
 0x7cc   :  { %3859 = vmatmul.mubr.msk.bf16.vlgmr.msra.gmra.mxu1 %vm1405_vm3, %v1651_v26 }
 0x7cd   :  { %3869 = vmatpush3.bf16.xpose.msra.mxu1 %v1759_v27  ;;  %3870 = vmatprep.mubr.msk.bf16.mxu1 %vm4513_vm1, %v4512_v13 }
 0x7ce   :  { %3880 = vmatprep.subr.bf16.mxu1 %v4512_v13 }
 0x7d1   :  { %v4305_v28 = vpop.eup %4304 }
 0x7d2   :  { %v1650_v29 = vmul.f32 %v4305_v28, %v4301_v8 }
 0x7d4   :  { %3871 = vmatmul.mubr.msk.bf16.vlgmr.msra.gmra.mxu1 %vm197_vm0, %v1752_v31  ;;  %v1652_v32 = vpack.c.bf16 %v1650_v29, %v1650_v29 }
 0x7d5   :  { %3882 = vmatprep.mubr.msk.bf16.mxu1 %vm4513_vm1, %v4512_v13 }
 0x7d6   :  { %3865 = vmatmul.mubr.msk.bf16.vlgmr.msra.gmra.mxu0 %vm1405_vm3, %v1652_v32 }
 0x7d7   :  { %3875 = vmatpush3.bf16.xpose.msra.mxu0 %v1809_v33  ;;  %3876 = vmatprep.mubr.msk.bf16.mxu0 %vm4513_vm1, %v4512_v13 }
 0x7d8   :  { %3886 = vmatprep.subr.bf16.mxu0 %v4512_v13 }
 0x7de   :  { %3877 = vmatmul.mubr.msk.bf16.vlgmr.msra.gmra.mxu0 %vm197_vm0, %v1802_v36 }
 0x7df   :  { %3888 = vmatprep.mubr.msk.bf16.mxu0 %vm4513_vm1, %v4512_v13 }
 0x88c   :  { %v4886_v37 = vpop.f32.mrf.mxu1 }
 0x88e   :  { %v3860_v38 = vpop.f32.mrf.mxu1 }
 0x890   :  { %v1699_v39 = vpop.f32.mrf.mxu1 }
 0x892   :  { %v3861_v40 = vpop.f32.mrf.mxu1 }
 0x894   :  { %v1795_v43 = vpop.f32.mrf.mxu1 }
 0x895   :  { %v1851_v44 = vmul.f32 0.17677669, %v1795_v43 }
 0x896   :  { %v4888_v45 = vpop.f32.mrf.mxu0  ;;  %v3872_v49 = vpop.f32.mrf.mxu1 }
 0x897   :  { %v3957_v51 = vpack.i.bf16 %v4888_v45, %v4886_v37  ;;  %v1853_v52 = vsel %vm1405_vm3, %v1851_v44, -inf }
 0x898   :  { %1854 = vmax.xlane.f32.xlu0 %v1853_v52  ;;  %v3866_v53 = vpop.f32.mrf.mxu0  ;;  %v1798_v54 = vpop.f32.mrf.mxu1 }
 0x89a   :  { %v1748_v55 = vpop.f32.mrf.mxu0  ;;  %v3873_v56 = vpop.f32.mrf.mxu1 }
 0x89c   :  { %v3867_v57 = vpop.f32.mrf.mxu0 }
 0x89e   :  { %v1845_v58 = vpop.f32.mrf.mxu0 }
 0x89f   :  { %v1852_v59 = vmul.f32 0.17677669, %v1845_v58 }
 0x8a0   :  { %v3878_v61 = vpop.f32.mrf.mxu0 }
 0x8a1   :  { %v1856_v62 = vsel %vm1405_vm3, %v1852_v59, -inf }
 0x8a2   :  { %1857 = vmax.xlane.f32.xlu1 %v1856_v62  ;;  %v1848_v63 = vpop.f32.mrf.mxu0 }
 0x8a4   :  { %v3879_v1 = vpop.f32.mrf.mxu0 }
 0x8b3   :  { %1925 = vrot.lane.b32.xlu1 %v4827_v17, %s4500_s23 }
 0x8b7   :  { %1975 = vrot.lane.b32.xlu1 %v4782_v34, %s4515_s17 }
 0x8bb   :  { %2025 = vrot.lane.b32.xlu1 %v4789_v41, %s4515_s17 }
 0x8bf   :  { %2023 = vrot.lane.b32.xlu1 %v4802_v48, %s4515_s17 }
 0x921   :  { %v1855_v2 = vpop.xlane.xlu0 %1854 }
 0x922   :  { %v1859_v3 = vsub.f32 %v1851_v44, %v1855_v2 }
 0x924   :  { %v1861_v4 = vmul.f32 1.442695, %v1859_v3 }
 0x926   :  { %4306 = vpow2.f32 %v1861_v4 }
 0x92b   :  { %v1858_v5 = vpop.xlane.xlu1 %1857 }
 0x92c   :  { %v1860_v6 = vsub.f32 %v1852_v59, %v1858_v5 }
 0x92e   :  { %v1863_v7 = vmul.f32 1.442695, %v1860_v6 }
 0x92f   :  { %v1926_v8 = vpop.permute.xlu1 %1925 }
 0x930   :  { %4308 = vpow2.f32 %v1863_v7  ;;  %v1931_v9 = vsel %vm1433_vm2, %v1926_v8, 0 }
 0x931   :  { %3887 = vmatpush3.bf16.msra.mxu0 %v1931_v9 }
 0x932   :  { %3898 = vmatprep.subr.bf16.mxu0 %v4512_v13 }
 0x933   :  { %v4307_v34 = vpop.eup %4306  ;;  %v1976_v26 = vpop.permute.xlu1 %1975 }
 0x934   :  { %v1865_v41 = vsel %vm1405_vm3, %v4307_v34, 0.0  ;;  %v1981_v28 = vsel %vm197_vm0, %v1976_v26, 0 }
 0x935   :  { %1866 = vadd.xlane.f32.xlu0 %v1865_v41 }
 0x937   :  { %v2026_v30 = vpop.permute.xlu1 %2025 }
 0x938   :  { %v2031_v33 = vsel %vm197_vm0, %v2026_v30, 0  ;;  %v4133_v30 = vld [vmem:[#allocation8 + $0x20] sm:$0xff]  }
 0x93b   :  { %v2024_v36 = vpop.permute.xlu1 %2023 }
 0x93d   :  { %v4309_v10 = vpop.eup %4308 }
 0x93e   :  { %v1868_v48 = vsel %vm1405_vm3, %v4309_v10, 0.0 }
 0x93f   :  { %1869 = vadd.xlane.f32.xlu0 %v1868_v48 }
 0x955   :  { %1877 = vrot.lane.b32.xlu0 %v4800_v46, %s4500_s23 }
 0x959   :  { %1973 = vrot.lane.b32.xlu0 %v4791_v42, %s4515_s17 }
 0x9be   :  { %v1867_v11 = vpop.xlane.xlu0 %1866 }
 0x9bf   :  { %4310 = vrcp.f32 %v1867_v11 }
 0x9c8   :  { %v1870_v12 = vpop.xlane.xlu0 %1869 }
 0x9c9   :  { %4312 = vrcp.f32 %v1870_v12 }
 0x9cc   :  { %v4311_v14 = vpop.eup %4310  ;;  %v1878_v18 = vpop.permute.xlu0 %1877 }
 0x9cd   :  { %v1883_v24 = vsel %vm1433_vm2, %v1878_v18, 0  ;;  %v1872_v25 = vmul.f32 %v4311_v14, %v4307_v34 }
 0x9ce   :  { %3881 = vmatpush3.bf16.msra.mxu1 %v1883_v24 }
 0x9cf   :  { %v1875_v27 = vpack.c.bf16 %v1872_v25, %v1872_v25  ;;  %3892 = vmatprep.subr.bf16.mxu1 %v4512_v13 }
 0x9d0   :  { %v1974_v31 = vpop.permute.xlu0 %1973 }
 0x9d1   :  { %3883 = vmatmul.mubr.msk.bf16.vlgmr.msra.gmra.mxu1 %vm1405_vm3, %v1875_v27 }
 0x9d2   :  { %3893 = vmatpush3.bf16.xpose.msra.mxu1 %v1981_v28  ;;  %3894 = vmatprep.mubr.msk.bf16.mxu1 %vm4513_vm1, %v4512_v13  ;;  %v4130_v28 = vld [vmem:[#allocation8 + $0x38] sm:$0xff]  }
 0x9d3   :  { %3904 = vmatprep.subr.bf16.mxu1 %v4512_v13 }
 0x9d6   :  { %v4313_v42 = vpop.eup %4312 }
 0x9d7   :  { %v1874_v29 = vmul.f32 %v4313_v42, %v4309_v10  ;;  %v4131_v42 = vld [vmem:[#allocation8 + $0x30] sm:$0xff]  }
 0x9d9   :  { %3895 = vmatmul.mubr.msk.bf16.vlgmr.msra.gmra.mxu1 %vm197_vm0, %v1974_v31  ;;  %v1876_v32 = vpack.c.bf16 %v1874_v29, %v1874_v29  ;;  %v4132_v29 = vld [vmem:[#allocation8 + $0x28] sm:$0xff]   ;;  %v4134_v31 = vld [vmem:[#allocation8 + $0x18] sm:$0xff]  }
 0x9da   :  { %3906 = vmatprep.mubr.msk.bf16.mxu1 %vm4513_vm1, %v4512_v13 }
 0x9db   :  { %3889 = vmatmul.mubr.msk.bf16.vlgmr.msra.gmra.mxu0 %vm1405_vm3, %v1876_v32  ;;  %v4135_v32 = vld [vmem:[#allocation8 + $0x10] sm:$0xff]  }
 0x9dc   :  { %3899 = vmatpush3.bf16.xpose.msra.mxu0 %v2031_v33  ;;  %3900 = vmatprep.mubr.msk.bf16.mxu0 %vm4513_vm1, %v4512_v13 }
 0x9dd   :  { %3910 = vmatprep.subr.bf16.mxu0 %v4512_v13 }
 0x9e3   :  { %3901 = vmatmul.mubr.msk.bf16.vlgmr.msra.gmra.mxu0 %vm197_vm0, %v2024_v36  ;;  %v4137_v36 = vld [vmem:[#allocation8] sm:$0xff]  }
 0x9e4   :  { %3912 = vmatprep.mubr.msk.bf16.mxu0 %vm4513_vm1, %v4512_v13 }
 0xa91   :  { %v1919_v38 = vpop.f32.mrf.mxu1 }
 0xa93   :  { %v3884_v39 = vpop.f32.mrf.mxu1 }
 0xa95   :  { %v1922_v40 = vpop.f32.mrf.mxu1 }
 0xa97   :  { %v3885_v43 = vpop.f32.mrf.mxu1 }
 0xa99   :  { %v2017_v44 = vpop.f32.mrf.mxu1 }
 0xa9a   :  { %v2073_v49 = vmul.f32 0.17677669, %v2017_v44 }
 0xa9b   :  { %v1967_v52 = vpop.f32.mrf.mxu0  ;;  %v3896_v53 = vpop.f32.mrf.mxu1 }
 0xa9c   :  { %v2075_v54 = vsel %vm1405_vm3, %v2073_v49, -inf  ;;  %v3962_v4 = vpack.i.bf16 %v1967_v52, %v1919_v38 }
 0xa9d   :  { %2076 = vmax.xlane.f32.xlu0 %v2075_v54  ;;  %v3890_v55 = vpop.f32.mrf.mxu0  ;;  %v2020_v56 = vpop.f32.mrf.mxu1 }
 0xa9f   :  { %v1970_v57 = vpop.f32.mrf.mxu0  ;;  %v3897_v58 = vpop.f32.mrf.mxu1 }
 0xaa1   :  { %v3891_v59 = vpop.f32.mrf.mxu0 }
 0xaa3   :  { %v2067_v61 = vpop.f32.mrf.mxu0 }
 0xaa4   :  { %v2074_v62 = vmul.f32 0.17677669, %v2067_v61 }
 0xaa5   :  { %v3902_v63 = vpop.f32.mrf.mxu0 }
 0xaa6   :  { %v2078_v1 = vsel %vm1405_vm3, %v2074_v62, -inf }
 0xaa7   :  { %2079 = vmax.xlane.f32.xlu1 %v2078_v1  ;;  %v2070_v2 = vpop.f32.mrf.mxu0 }
 0xaa9   :  { %v3903_v3 = vpop.f32.mrf.mxu0 }
 0xab8   :  { %2147 = vrot.lane.b32.xlu1 %v4827_v17, %s4515_s17 }
 0xabc   :  { %3958 = vrot.lane.b32.xlu1 %v3957_v51, %s4515_s17 }
 0xac0   :  { %3963 = vrot.lane.b32.xlu1 %v3962_v4, %s4500_s23 }
 0xb26   :  { %v2077_v5 = vpop.xlane.xlu0 %2076 }
 0xb27   :  { %v2081_v6 = vsub.f32 %v2073_v49, %v2077_v5 }
 0xb29   :  { %v2083_v7 = vmul.f32 1.442695, %v2081_v6 }
 0xb2b   :  { %4314 = vpow2.f32 %v2083_v7  ;;  %v3549_v7 = vld [vmem:[#allocation13 + $0xa] ss:$0 sm:$0xff] }
 0xb30   :  { %v2080_v8 = vpop.xlane.xlu1 %2079 }
 0xb31   :  { %v2082_v9 = vsub.f32 %v2074_v62, %v2080_v8 }
 0xb33   :  { %v2085_v34 = vmul.f32 1.442695, %v2082_v9 }
 0xb34   :  { %v2148_v41 = vpop.permute.xlu1 %2147 }
 0xb35   :  { %4316 = vpow2.f32 %v2085_v34  ;;  %v2153_v10 = vsel %vm1433_vm2, %v2148_v41, 0 }
 0xb36   :  { %3911 = vmatpush3.bf16.msra.mxu0 %v2153_v10 }
 0xb38   :  { %v4315_v17 = vpop.eup %4314  ;;  %v3959_v54 = vpop.permute.xlu1 %3958 }
 0xb39   :  { %v2087_v48 = vsel %vm1405_vm3, %v4315_v17, 0.0  ;;  %v3961_v56 = vunpack.i.h.bf16 %v3959_v54  ;;  %v3960_v57 = vunpack.i.l.bf16 %v3959_v54  ;;  %v4180_v54 = vld [vmem:[#allocation11 + $0x80] ss:$16 sps:$4 sm:$0xff]  }
 0xb3a   :  { %2088 = vadd.xlane.f32.xlu0 %v2087_v48  ;;  %v4138_v48 = vld [vmem:[#allocation10 + $0x70] ss:$8 sps:$4 sm:$0xff]  }
 0xb3b   :  { %v2220_v61 = vsel %vm197_vm0, %v4849_v50, %v3961_v56  ;;  %v2219_v62 = vsel %vm197_vm0, %v4846_v35, %v3960_v57  ;;  %v4186_v56 = vld [vmem:[#allocation11 + $0x60] ss:$16 sps:$4 sm:$0xff]   ;;  %v4194_v57 = vld [vmem:[#allocation11 + $0x44] ss:$16 sps:$4 sm:$0xff]  }
 0xb3c   :  { %v3964_v55 = vpop.permute.xlu1 %3963 }
 0xb3d   :  { %v3966_v58 = vunpack.i.h.bf16 %v3964_v55  ;;  %v3965_v59 = vunpack.i.l.bf16 %v3964_v55  ;;  %v4188_v55 = vld [vmem:[#allocation11 + $0x64] ss:$16 sps:$4 sm:$0xff]  }
 0xb3f   :  { %v2222_v2 = vsel %vm2221_vm4, %v2219_v62, %v3965_v59  ;;  %v2223_v3 = vsel %vm2221_vm4, %v2220_v61, %v3966_v58  ;;  %v4192_v58 = vld [vmem:[#allocation11 + $0x40] ss:$16 sps:$4 sm:$0xff]   ;;  %v4200_v59 = vld [vmem:[#allocation11 + $0x24] ss:$16 sps:$4 sm:$0xff]  }
 0xb40   :  { %v4206_v61 = vld [vmem:[#allocation11 + $0x4] ss:$16 sps:$4 sm:$0xff]   ;;  %v4204_v62 = vld [vmem:[#allocation11] ss:$16 sps:$4 sm:$0xff]  }
 0xb42   :  { %v4317_v37 = vpop.eup %4316 }
 0xb43   :  { %v2090_v45 = vsel %vm1405_vm3, %v4317_v37, 0.0 }
 0xb44   :  { %2091 = vadd.xlane.f32.xlu0 %v2090_v45 }
 0xb5a   :  { %2099 = vrot.lane.b32.xlu0 %v4800_v46, %s4515_s17 }
 0xbc3   :  { %v2089_v51 = vpop.xlane.xlu0 %2088 }
 0xbc4   :  { %4318 = vrcp.f32 %v2089_v51 }
 0xbcd   :  { %v2092_v11 = vpop.xlane.xlu0 %2091 }
 0xbce   :  { %4320 = vrcp.f32 %v2092_v11 }
 0xbd1   :  { %v4319_v12 = vpop.eup %4318  ;;  %v2100_v14 = vpop.permute.xlu0 %2099 }
 0xbd2   :  { %v2105_v18 = vsel %vm1433_vm2, %v2100_v14, 0  ;;  %v2094_v24 = vmul.f32 %v4319_v12, %v4315_v17 }
 0xbd3   :  { %3905 = vmatpush3.bf16.msra.mxu1 %v2105_v18 }
 0xbd4   :  { %v2097_v25 = vpack.c.bf16 %v2094_v24, %v2094_v24  ;;  %3916 = vmatprep.subr.bf16.mxu1 %v4512_v13  ;;  %v4143_v24 = vld [vmem:[#allocation10 + $0x64] ss:$8 sps:$4 sm:$0xff]  }
 0xbd6   :  { %3907 = vmatmul.mubr.msk.bf16.vlgmr.msra.gmra.mxu1 %vm1405_vm3, %v2097_v25  ;;  %v4141_v25 = vld [vmem:[#allocation10 + $0x60] ss:$8 sps:$4 sm:$0xff]  }
 0xbd7   :  { %3932 = vmatprep.mubr.msk.bf16.mxu1 %vm4513_vm1, %v4512_v13  ;;  %3917 = vmatpush3.bf16.msra.mxu1 %v4130_v28  ;;  %v4149_v28 = vld [vmem:[#allocation10 + $0x44] ss:$8 sps:$4 sm:$0xff]  }
 0xbd8   :  { %3918 = vmatprep.subr.bf16.mxu1 %v4512_v13 }
 0xbdb   :  { %v4321_v26 = vpop.eup %4320  ;;  %3919 = vmatpush3.bf16.msra.mxu1 %v4131_v42  ;;  %v4152_v42 = vld [vmem:[#allocation10 + $0x34] ss:$8 sps:$4 sm:$0xff]  }
 0xbdc   :  { %v2096_v46 = vmul.f32 %v4321_v26, %v4317_v37  ;;  %3920 = vmatprep.subr.bf16.mxu1 %v4512_v13  ;;  %v4140_v37 = vld [vmem:[#allocation10 + $0x74] ss:$8 sps:$4 sm:$0xff]  }
 0xbdd   :  { %2492 = vmatprep.subr.bf16.mxu0 %v4140_v37  ;;  %v4146_v26 = vld [vmem:[#allocation10 + $0x54] ss:$8 sps:$4 sm:$0xff]  }
 0xbde   :  { %v2098_v27 = vpack.c.bf16 %v2096_v46, %v2096_v46  ;;  %v4144_v46 = vld [vmem:[#allocation10 + $0x50] ss:$8 sps:$4 sm:$0xff]  }
 0xbdf   :  { %3921 = vmatpush3.bf16.msra.mxu1 %v4132_v29  ;;  %v4150_v29 = vld [vmem:[#allocation10 + $0x30] ss:$8 sps:$4 sm:$0xff]  }
 0xbe0   :  { %3913 = vmatmul.mubr.msk.bf16.vlgmr.msra.gmra.mxu0 %vm1405_vm3, %v2098_v27  ;;  %3922 = vmatprep.subr.bf16.mxu1 %v4512_v13  ;;  %v4147_v27 = vld [vmem:[#allocation10 + $0x40] ss:$8 sps:$4 sm:$0xff]  }
 0xbe1   :  { %2524 = vmatprep.mubr.bf16.mxu0 %v4511_v0  ;;  %v4136_v0 = vld [vmem:[#allocation8 + $0x8] sm:$0xff]   ;;  %2493 = vmatpush1.bf16.msra.mxu0 %v4138_v48 }
 0xbe2   :  { %2494 = vmatprep.subr.bf16.mxu0 %v4143_v24 }
 0xbe3   :  { %3923 = vmatpush3.bf16.msra.mxu1 %v4133_v30  ;;  %v4155_v30 = vld [vmem:[#allocation10 + $0x24] ss:$8 sps:$4 sm:$0xff]  }
 0xbe4   :  { %3924 = vmatprep.subr.bf16.mxu1 %v4512_v13 }
 0xbe5   :  { %2495 = vmatpush1.bf16.msra.mxu0 %v4141_v25 }
 0xbe6   :  { %2496 = vmatprep.subr.bf16.mxu0 %v4146_v26  ;;  %v4165_v26 = vld [vmem:[#allocation11 + $0xe8] ss:$16 sps:$4 sm:$0xff]  }
 0xbe7   :  { %3925 = vmatpush3.bf16.msra.mxu1 %v4134_v31  ;;  %v4153_v31 = vld [vmem:[#allocation10 + $0x20] ss:$8 sps:$4 sm:$0xff]  }
 0xbe8   :  { %3926 = vmatprep.subr.bf16.mxu1 %v4512_v13 }
 0xbe9   :  { %2497 = vmatpush1.bf16.msra.mxu0 %v4144_v46 }
 0xbea   :  { %2498 = vmatprep.subr.bf16.mxu0 %v4149_v28  ;;  %v4171_v28 = vld [vmem:[#allocation11 + $0xc8] ss:$16 sps:$4 sm:$0xff]  }
 0xbeb   :  { %3927 = vmatpush3.bf16.msra.mxu1 %v4135_v32  ;;  %v4158_v32 = vld [vmem:[#allocation10 + $0x14] ss:$8 sps:$4 sm:$0xff]  }
 0xbec   :  { %3928 = vmatprep.subr.bf16.mxu1 %v4512_v13 }
 0xbed   :  { %2499 = vmatpush1.bf16.msra.mxu0 %v4147_v27  ;;  %v4173_v27 = vld [vmem:[#allocation11 + $0xcc] ss:$16 sps:$4 sm:$0xff]  }
 0xbee   :  { %2500 = vmatprep.subr.bf16.mxu0 %v4152_v42  ;;  %v4179_v42 = vld [vmem:[#allocation11 + $0xac] ss:$16 sps:$4 sm:$0xff]  }
 0xbef   :  { %3929 = vmatpush3.bf16.msra.mxu1 %v4136_v0  ;;  %v4156_v0 = vld [vmem:[#allocation10 + $0x10] ss:$8 sps:$4 sm:$0xff]  }
 0xbf0   :  { %3930 = vmatprep.subr.bf16.mxu1 %v4512_v13 }
 0xbf1   :  { %2501 = vmatpush1.bf16.msra.mxu0 %v4150_v29  ;;  %v4177_v29 = vld [vmem:[#allocation11 + $0xa8] ss:$16 sps:$4 sm:$0xff]  }
 0xbf2   :  { %2502 = vmatprep.subr.bf16.mxu0 %v4155_v30  ;;  %v4183_v30 = vld [vmem:[#allocation11 + $0x88] ss:$16 sps:$4 sm:$0xff]  }
 0xbf3   :  { %3931 = vmatpush3.bf16.msra.mxu1 %v4137_v36  ;;  %v4159_v36 = vld [vmem:[#allocation10] ss:$8 sps:$4 sm:$0xff]  }
 0xbf5   :  { %2503 = vmatpush1.bf16.msra.mxu0 %v4153_v31  ;;  %v4189_v31 = vld [vmem:[#allocation11 + $0x68] ss:$16 sps:$4 sm:$0xff]  }
 0xbf6   :  { %2504 = vmatprep.subr.bf16.mxu0 %v4158_v32  ;;  %v4197_v32 = vld [vmem:[#allocation11 + $0x4c] ss:$16 sps:$4 sm:$0xff]  }
 0xbf9   :  { %2505 = vmatpush1.bf16.msra.mxu0 %v4156_v0  ;;  %v4195_v0 = vld [vmem:[#allocation11 + $0x48] ss:$16 sps:$4 sm:$0xff]  }
 0xc96   :  { %v2141_v33 = vpop.f32.mrf.mxu1 }
 0xc98   :  { %v3908_v38 = vpop.f32.mrf.mxu1 }
 0xc99   :  { %v4162_v38 = vld [vmem:[#allocation11 + $0xe0] ss:$16 sps:$4 sm:$0xff]  }
 0xc9a   :  { %v2144_v39 = vpop.f32.mrf.mxu1 }
 0xc9b   :  { %v4164_v39 = vld [vmem:[#allocation11 + $0xe4] ss:$16 sps:$4 sm:$0xff]  }
 0xc9c   :  { %v3909_v40 = vpop.f32.mrf.mxu1  ;;  %2947 = vmatprep.subr.bf16.mxu1 %v4164_v39  ;;  %v4207_v39 = vld [vmem:[#allocation11 + $0x8] ss:$16 sps:$4 sm:$0xff]  }
 0xc9d   :  { %v4167_v40 = vld [vmem:[#allocation11 + $0xec] ss:$16 sps:$4 sm:$0xff]  }
 0xca0   :  { %v2189_v43 = vpop.f32.mrf.mxu0 }
 0xca1   :  { %v3967_v44 = vpack.i.bf16 %v2189_v43, %v2141_v33  ;;  %v4161_v33 = vld [vmem:[#allocation10 + $0x4] ss:$8 sps:$4 sm:$0xff]  }
 0xca2   :  { %v3914_v49 = vpop.f32.mrf.mxu0  ;;  %2506 = vmatprep.subr.bf16.mxu0 %v4161_v33  ;;  %v4170_v43 = vld [vmem:[#allocation11 + $0xc4] ss:$16 sps:$4 sm:$0xff]   ;;  %v4203_v33 = vld [vmem:[#allocation11 + $0x2c] ss:$16 sps:$4 sm:$0xff]  }
 0xca3   :  { %3968 = vrot.lane.b32.xlu0 %v3967_v44, %s4514_s4  ;;  %2507 = vmatpush1.bf16.msra.mxu0 %v4159_v36  ;;  %v4168_v44 = vld [vmem:[#allocation11 + $0xc0] ss:$16 sps:$4 sm:$0xff]   ;;  %v4176_v49 = vld [vmem:[#allocation11 + $0xa4] ss:$16 sps:$4 sm:$0xff]   ;;  %v4201_v36 = vld [vmem:[#allocation11 + $0x28] ss:$16 sps:$4 sm:$0xff]  }
 0xca4   :  { %v2192_v52 = vpop.f32.mrf.mxu0  ;;  %2990 = vmatprep.subr.bf16.mxu0 %v4167_v40  ;;  %v4215_v40 = vld [vmem:[#allocation11 + $0x1ec] ss:$16 sps:$4 sm:$0xff]  }
 0xca5   :  { %v4174_v52 = vld [vmem:[#allocation11 + $0xa0] ss:$16 sps:$4 sm:$0xff]  }
 0xca6   :  { %v3915_v53 = vpop.f32.mrf.mxu0 }
 0xca7   :  { %v4182_v53 = vld [vmem:[#allocation11 + $0x84] ss:$16 sps:$4 sm:$0xff]  }
 0xd15   :  { %v3969_v13 = vpop.permute.xlu0 %3968 }
 0xd16   :  { %v3971_v63 = vunpack.i.h.bf16 %v3969_v13  ;;  %v3970_v1 = vunpack.i.l.bf16 %v3969_v13  ;;  %v4198_v13 = vld [vmem:[#allocation11 + $0x20] ss:$16 sps:$4 sm:$0xff]  }
 0xd18   :  { %v2226_v4 = vsel %vm2224_vm5, %v2223_v3, %v3971_v63  ;;  %v2225_v5 = vsel %vm2224_vm5, %v2222_v2, %v3970_v1  ;;  %v4212_v63 = vld [vmem:[#allocation11 + $0x1e4] ss:$16 sps:$4 sm:$0xff]   ;;  %v4210_v1 = vld [vmem:[#allocation11 + $0x1e0] ss:$16 sps:$4 sm:$0xff]  }
 0xd19   :  { %v2227_v6 = vpack.c.bf16 %v2226_v4, %v2225_v5  ;;  %v4218_v2 = vld [vmem:[#allocation11 + $0x1c4] ss:$16 sps:$4 sm:$0xff]   ;;  %v4216_v3 = vld [vmem:[#allocation11 + $0x1c0] ss:$16 sps:$4 sm:$0xff]  }
 0xd1a   :  { %v4224_v4 = vld [vmem:[#allocation11 + $0x1a4] ss:$16 sps:$4 sm:$0xff]   ;;  %v4222_v5 = vld [vmem:[#allocation11 + $0x1a0] ss:$16 sps:$4 sm:$0xff]  }
 0xd1b   :  { %3933 = vmatmul.mubr.bf16.vlgmr.msra.gmra.mxu1 %v2227_v6  ;;  %v4230_v6 = vld [vmem:[#allocation11 + $0x184] ss:$16 sps:$4 sm:$0xff]  }
 0xd1c   :  { %2948 = vmatpush1.bf16.msra.mxu1 %v4162_v38  ;;  %v4209_v38 = vld [vmem:[#allocation11 + $0xc] ss:$16 sps:$4 sm:$0xff]  }
 0xd1d   :  { %2949 = vmatprep.subr.bf16.mxu1 %v4170_v43  ;;  %v4213_v43 = vld [vmem:[#allocation11 + $0x1e8] ss:$16 sps:$4 sm:$0xff]  }
 0xd20   :  { %2950 = vmatpush1.bf16.msra.mxu1 %v4168_v44  ;;  %v4221_v44 = vld [vmem:[#allocation11 + $0x1cc] ss:$16 sps:$4 sm:$0xff]  }
 0xd21   :  { %2951 = vmatprep.subr.bf16.mxu1 %v4176_v49  ;;  %v4219_v49 = vld [vmem:[#allocation11 + $0x1c8] ss:$16 sps:$4 sm:$0xff]  }
 0xd24   :  { %2952 = vmatpush1.bf16.msra.mxu1 %v4174_v52  ;;  %v4227_v52 = vld [vmem:[#allocation11 + $0x1ac] ss:$16 sps:$4 sm:$0xff]  }
 0xd25   :  { %2953 = vmatprep.subr.bf16.mxu1 %v4182_v53  ;;  %v4225_v53 = vld [vmem:[#allocation11 + $0x1a8] ss:$16 sps:$4 sm:$0xff]  }
 0xd28   :  { %2954 = vmatpush1.bf16.msra.mxu1 %v4180_v54  ;;  %v4233_v54 = vld [vmem:[#allocation11 + $0x18c] ss:$16 sps:$4 sm:$0xff]  }
 0xd29   :  { %2955 = vmatprep.subr.bf16.mxu1 %v4188_v55  ;;  %v4231_v55 = vld [vmem:[#allocation11 + $0x188] ss:$16 sps:$4 sm:$0xff]  }
 0xd2c   :  { %2956 = vmatpush1.bf16.msra.mxu1 %v4186_v56  ;;  %v4239_v56 = vld [vmem:[#allocation11 + $0x16c] ss:$16 sps:$4 sm:$0xff]  }
 0xd2d   :  { %2957 = vmatprep.subr.bf16.mxu1 %v4194_v57  ;;  %v4237_v57 = vld [vmem:[#allocation11 + $0x168] ss:$16 sps:$4 sm:$0xff]  }
 0xd30   :  { %2958 = vmatpush1.bf16.msra.mxu1 %v4192_v58  ;;  %v4242_v58 = vld [vmem:[#allocation11 + $0x144] ss:$16 sps:$4 sm:$0xff]  }
 0xd31   :  { %2959 = vmatprep.subr.bf16.mxu1 %v4200_v59  ;;  %v4245_v59 = vld [vmem:[#allocation11 + $0x14c] ss:$16 sps:$4 sm:$0xff]  }
 0xd34   :  { %2960 = vmatpush1.bf16.msra.mxu1 %v4198_v13  ;;  %v4240_v13 = vld [vmem:[#allocation11 + $0x140] ss:$16 sps:$4 sm:$0xff]  }
 0xd35   :  { %2961 = vmatprep.subr.bf16.mxu1 %v4206_v61  ;;  %v4243_v61 = vld [vmem:[#allocation11 + $0x148] ss:$16 sps:$4 sm:$0xff]  }
 0xd38   :  { %2962 = vmatpush1.bf16.msra.mxu1 %v4204_v62  ;;  %v4248_v62 = vld [vmem:[#allocation11 + $0x124] ss:$16 sps:$4 sm:$0xff]  }
 0xd39   :  { %2963 = vmatprep.subr.bf16.mxu1 %v4212_v63  ;;  %v4251_v63 = vld [vmem:[#allocation11 + $0x12c] ss:$16 sps:$4 sm:$0xff]  }
 0xd3c   :  { %2964 = vmatpush2.bf16.msra.mxu1 %v4210_v1  ;;  %v4246_v1 = vld [vmem:[#allocation11 + $0x120] ss:$16 sps:$4 sm:$0xff]  }
 0xd3d   :  { %2965 = vmatprep.subr.bf16.mxu1 %v4218_v2  ;;  %v4249_v2 = vld [vmem:[#allocation11 + $0x128] ss:$16 sps:$4 sm:$0xff]  }
 0xd40   :  { %2966 = vmatpush2.bf16.msra.mxu1 %v4216_v3  ;;  %v4254_v3 = vld [vmem:[#allocation11 + $0x104] ss:$16 sps:$4 sm:$0xff]  }
 0xd41   :  { %2967 = vmatprep.subr.bf16.mxu1 %v4224_v4  ;;  %v4257_v4 = vld [vmem:[#allocation11 + $0x10c] ss:$16 sps:$4 sm:$0xff]  }
 0xd44   :  { %2968 = vmatpush2.bf16.msra.mxu1 %v4222_v5  ;;  %v4252_v5 = vld [vmem:[#allocation11 + $0x100] ss:$16 sps:$4 sm:$0xff]  }
 0xd45   :  { %2969 = vmatprep.subr.bf16.mxu1 %v4230_v6  ;;  %v4255_v6 = vld [vmem:[#allocation11 + $0x108] ss:$16 sps:$4 sm:$0xff]  }
 0xddb   :  { %v2333_v8 = vpop.f32.mrf.mxu1 }
 0xddc   :  { %v2334_v9 = vadd.f32 %v3549_v7, %v2333_v8  ;;  %v4236_v8 = vld [vmem:[#allocation11 + $0x164] ss:$16 sps:$4 sm:$0xff]  }
 0xddd   :  { %v3934_v34 = vpop.f32.mrf.mxu1 }
 0xdde   :  { %v2340_v41 = vadd.f32 %v2334_v9, %v4769_v15  ;;  %v4234_v9 = vld [vmem:[#allocation11 + $0x160] ss:$16 sps:$4 sm:$0xff]  }
 0xddf   :  { %v2336_v10 = vpop.f32.mrf.mxu1 }
 0xde0   :  { %v2337_v17 = vadd.f32 %v3549_v7, %v2336_v10  ;;  %2344 = vadd.xlane.f32.xlu1 %v2340_v41  ;;  %v4228_v7 = vld [vmem:[#allocation11 + $0x180] ss:$16 sps:$4 sm:$0xff]  }
 0xde1   :  { %v3935_v50 = vpop.f32.mrf.mxu1  ;;  %2970 = vmatpush2.bf16.msra.mxu1 %v4228_v7  ;;  %v4258_v7 = vld [vmem:[%s5094_s8 + $0x78] sm:$0xff]  }
 0xde2   :  { %v2341_v35 = vadd.f32 %v2337_v17, %v4771_v16  ;;  %2971 = vmatprep.subr.bf16.mxu1 %v4236_v8  ;;  %v4259_v8 = vld [vmem:[%s5094_s8 + $0xf8] sm:$0xff]  }
 0xde4   :  { %2346 = vadd.xlane.f32.xlu0 %v2341_v35 }
 0xde5   :  { %2972 = vmatpush2.bf16.msra.mxu1 %v4234_v9  ;;  %v2400_v9 = vld [vmem:[#allocation13 + $0xd] sm:$0x3] }
 0xde6   :  { %2973 = vmatprep.subr.bf16.mxu1 %v4242_v58  ;;  %v4286_v58 = vld [vmem:[%s5094_s8 + $0x40] sm:$0xff]  }
 0xde9   :  { %2974 = vmatpush2.bf16.msra.mxu1 %v4240_v13  ;;  %v4288_v13 = vld [vmem:[%s5094_s8] sm:$0xff]  }
 0xdea   :  { %2975 = vmatprep.subr.bf16.mxu1 %v4248_v62  ;;  %v2605_v62 = vld [vmem:[#allocation13 + $0xf] sm:$0xf] }
 0xded   :  { %2976 = vmatpush2.bf16.msra.mxu1 %v4246_v1 }
 0xdee   :  { %2977 = vmatprep.subr.bf16.mxu1 %v4254_v3  ;;  %v2622_v3 = vrot.slane %v2605_v62, %v344_v21 }
 0xdf1   :  { %2978 = vmatpush2.bf16.msra.mxu1 %v4252_v5  ;;  %v2618_v5 = vrot.slane %v2605_v62, %v4626_v23 }
 0xdf2   :  { %3748 = vmatprep.subr.bf16.mxu1 %v4258_v7 }
 0xe69   :  { %v2345_v45 = vpop.xlane.xlu1 %2344 }
 0xe6a   :  { %v2349_v51 = vmul.f32 0.0078125, %v2345_v45  ;;  %v3558_v45 = vld [vmem:[#allocation13 + $0xb] ss:$0 sm:$0xff] }
 0xe6c   :  { %v4963_v11 = vsub.f32 %v2340_v41, %v2349_v51 }
 0xe6d   :  { %v2347_v12 = vpop.xlane.xlu0 %2346 }
 0xe6e   :  { %v2350_v14 = vmul.f32 0.0078125, %v2347_v12  ;;  %v2353_v15 = vmul.f32 %v4963_v11, %v4963_v11 }
 0xe70   :  { %v4967_v18 = vsub.f32 %v2341_v35, %v2350_v14  ;;  %2355 = vadd.xlane.f32.xlu0 %v2353_v15  ;;  %v3559_v15 = vld [vmem:[#allocation13 + $0xc] ss:$0 sm:$0xff] }
 0xe72   :  { %v2354_v16 = vmul.f32 %v4967_v18, %v4967_v18 }
 0xe74   :  { %2357 = vadd.xlane.f32.xlu0 %v2354_v16 }
 0xef9   :  { %v2356_v34 = vpop.xlane.xlu0 %2355 }
 0xefa   :  { %v2359_v41 = vmul.f32 0.0078125, %v2356_v34 }
 0xefc   :  { %v2361_v10 = vadd.f32 1e-05, %v2359_v41  ;;  %v2409_v41 = vrot.slane %v2400_v9, %v4619_v20 }
 0xefd   :  { %v2358_v17 = vpop.xlane.xlu0 %2357 }
 0xefe   :  { %4322 = vrsqrt.f32 %v2361_v10  ;;  %v2360_v50 = vmul.f32 0.0078125, %v2358_v17  ;;  %v2405_v10 = vrot.slane %v2400_v9, %v4623_v22 }
 0xf00   :  { %v2362_v35 = vadd.f32 1e-05, %v2360_v50 }
 0xf02   :  { %4324 = vrsqrt.f32 %v2362_v35 }
 0xf0b   :  { %v4323_v48 = vpop.eup %4322 }
 0xf0c   :  { %v2365_v37 = vmul.f32 %v4323_v48, %v4963_v11  ;;  %v4185_v11 = vld [vmem:[#allocation11 + $0x8c] ss:$16 sps:$4 sm:$0xff]  }
 0xf0e   :  { %v2373_v14 = vmul.f32 %v3558_v45, %v2365_v37 }
 0xf0f   :  { %v4325_v51 = vpop.eup %4324 }
 0xf10   :  { %v2366_v12 = vmul.f32 %v4325_v51, %v4967_v18  ;;  %v2381_v24 = vadd.f32 %v3559_v15, %v2373_v14  ;;  %v4191_v18 = vld [vmem:[#allocation11 + $0x6c] ss:$16 sps:$4 sm:$0xff]  }
 0xf12   :  { %v2374_v16 = vmul.f32 %v3558_v45, %v2366_v12 }
 0xf14   :  { %v2382_v25 = vadd.f32 %v3559_v15, %v2374_v16 }
 0xf16   :  { %v2383_v46 = vpack.c.bf16 %v2382_v25, %v2381_v24  ;;  %v4260_v25 = vld [vmem:[%s5094_s8 + $0x38] sm:$0xff]  }
 0xf18   :  { %2525 = vmatmul.mubr.bf16.vlgmr.msra.gmra.mxu0 %v2383_v46 }
 0xf19   :  { %2991 = vmatpush1.bf16.msra.mxu0 %v4165_v26  ;;  %v4261_v26 = vld [vmem:[%s5094_s8 + $0xb8] sm:$0xff]  }
 0xf1a   :  { %2992 = vmatprep.subr.bf16.mxu0 %v4173_v27  ;;  %v4262_v27 = vld [vmem:[%s5094_s8 + $0x70] sm:$0xff]  }
 0xf1d   :  { %2993 = vmatpush1.bf16.msra.mxu0 %v4171_v28  ;;  %v4263_v28 = vld [vmem:[%s5094_s8 + $0xf0] sm:$0xff]  }
 0xf1e   :  { %2994 = vmatprep.subr.bf16.mxu0 %v4179_v42  ;;  %v4264_v42 = vld [vmem:[%s5094_s8 + $0x30] sm:$0xff]  }
 0xf21   :  { %2995 = vmatpush1.bf16.msra.mxu0 %v4177_v29  ;;  %v4265_v29 = vld [vmem:[%s5094_s8 + $0xb0] sm:$0xff]  }
 0xf22   :  { %2996 = vmatprep.subr.bf16.mxu0 %v4185_v11  ;;  %v4266_v11 = vld [vmem:[%s5094_s8 + $0x68] sm:$0xff]  }
 0xf25   :  { %2997 = vmatpush1.bf16.msra.mxu0 %v4183_v30  ;;  %v4267_v30 = vld [vmem:[%s5094_s8 + $0xe8] sm:$0xff]  }
 0xf26   :  { %2998 = vmatprep.subr.bf16.mxu0 %v4191_v18  ;;  %v4268_v18 = vld [vmem:[%s5094_s8 + $0x28] sm:$0xff]  }
 0xf29   :  { %2999 = vmatpush1.bf16.msra.mxu0 %v4189_v31  ;;  %v4269_v31 = vld [vmem:[%s5094_s8 + $0xa8] sm:$0xff]  }
 0xf2a   :  { %3000 = vmatprep.subr.bf16.mxu0 %v4197_v32  ;;  %v4270_v32 = vld [vmem:[%s5094_s8 + $0x60] sm:$0xff]  }
 0xf2d   :  { %3001 = vmatpush1.bf16.msra.mxu0 %v4195_v0  ;;  %v4271_v0 = vld [vmem:[%s5094_s8 + $0xe0] sm:$0xff]  }
 0xf2e   :  { %3002 = vmatprep.subr.bf16.mxu0 %v4203_v33  ;;  %v4272_v33 = vld [vmem:[%s5094_s8 + $0x20] sm:$0xff]  }
 0xf31   :  { %3003 = vmatpush1.bf16.msra.mxu0 %v4201_v36  ;;  %v4273_v36 = vld [vmem:[%s5094_s8 + $0xa0] sm:$0xff]  }
 0xf32   :  { %3004 = vmatprep.subr.bf16.mxu0 %v4209_v38  ;;  %v4274_v38 = vld [vmem:[%s5094_s8 + $0x58] sm:$0xff]  }
 0xf35   :  { %3005 = vmatpush1.bf16.msra.mxu0 %v4207_v39  ;;  %v4275_v39 = vld [vmem:[%s5094_s8 + $0xd8] sm:$0xff]  }
 0xf36   :  { %3006 = vmatprep.subr.bf16.mxu0 %v4215_v40  ;;  %v4276_v40 = vld [vmem:[%s5094_s8 + $0x18] sm:$0xff]  }
 0xf39   :  { %3007 = vmatpush2.bf16.msra.mxu0 %v4213_v43  ;;  %v4277_v43 = vld [vmem:[%s5094_s8 + $0x98] sm:$0xff]  }
 0xf3a   :  { %3008 = vmatprep.subr.bf16.mxu0 %v4221_v44  ;;  %v4278_v44 = vld [vmem:[%s5094_s8 + $0x50] sm:$0xff]  }
 0xf3d   :  { %3009 = vmatpush2.bf16.msra.mxu0 %v4219_v49  ;;  %v4279_v49 = vld [vmem:[%s5094_s8 + $0xd0] sm:$0xff]  }
 0xf3e   :  { %3010 = vmatprep.subr.bf16.mxu0 %v4227_v52  ;;  %v4280_v52 = vld [vmem:[%s5094_s8 + $0x10] sm:$0xff]  }
 0xf41   :  { %3011 = vmatpush2.bf16.msra.mxu0 %v4225_v53  ;;  %v4281_v53 = vld [vmem:[%s5094_s8 + $0x90] sm:$0xff]  }
 0xf42   :  { %3012 = vmatprep.subr.bf16.mxu0 %v4233_v54  ;;  %v4282_v54 = vld [vmem:[%s5094_s8 + $0x48] sm:$0xff]  }
 0xf45   :  { %3013 = vmatpush2.bf16.msra.mxu0 %v4231_v55  ;;  %v4283_v55 = vld [vmem:[%s5094_s8 + $0xc8] sm:$0xff]  }
 0xf46   :  { %3014 = vmatprep.subr.bf16.mxu0 %v4239_v56  ;;  %v4284_v56 = vld [vmem:[%s5094_s8 + $0x8] sm:$0xff]  }
 0xf49   :  { %3015 = vmatpush2.bf16.msra.mxu0 %v4237_v57  ;;  %v4285_v57 = vld [vmem:[%s5094_s8 + $0x88] sm:$0xff]  }
 0xf4a   :  { %3016 = vmatprep.subr.bf16.mxu0 %v4245_v59  ;;  %v4287_v59 = vld [vmem:[%s5094_s8 + $0xc0] sm:$0xff]  }
 0xf4d   :  { %3017 = vmatpush2.bf16.msra.mxu0 %v4243_v61  ;;  %v4289_v61 = vld [vmem:[%s5094_s8 + $0x80] sm:$0xff]   ;;  %s4516_s8 = smov [#allocation14]  }
 0xf4e   :  { %3018 = vmatprep.subr.bf16.mxu0 %v4251_v63  ;;  %s3399_s0 = sshll.u32 %s4516_s8, 4  ;;  %s3400_s0 = int_to_ptr.vmem [resolvable:$true] %s3399_s0 }
 0xf4f   :  { %s4466_s26 = scalar_lea.vmem %s3400_s0, 256  ;;  %p4471_p8 = scmp.lt.s32.totalorder %s3400_s0, %s3400_s0 }
 0xf50   :  { %p4467_p7 = scmp.ne.s32.totalorder %s3400_s0, %s4466_s26  ;;  %p4472_p9 = scmp.lt.s32.totalorder %s4466_s26, %s4466_s26 }
 0xf51   :  { %3019 = vmatpush2.bf16.msra.mxu0 %v4249_v2  ;;  %v2614_v2 = vrot.slane %v2605_v62, %v4619_v20 }
 0xf52   :  { %3020 = vmatprep.subr.bf16.mxu0 %v4257_v4  ;;  %v2610_v4 = vrot.slane %v2605_v62, %v4623_v22  ;;  %p4473_p10 = por %p4472_p9, %p4471_p8 }
 0xf54   :  { %p4474_p11 = pnand %p4473_p10, %p4467_p7 }
 0xf55   :  { %3021 = vmatpush2.bf16.msra.mxu0 %v4255_v6 }
 0xf56   :  { %3770 = vmatprep.subr.bf16.mxu0 %v4259_v8 }
 0xfd8   :  { %v2526_v34 = vpop.f32.mrf.mxu0 }
 0xfd9   :  { %v2527_v37 = vadd.f32 %v2526_v34, %v2405_v10 }
 0xfda   :  { %v2528_v17 = vpop.f32.mrf.mxu0 }
 0xfdb   :  { %v2529_v35 = vadd.f32 %v2528_v17, %v2409_v41  ;;  %v2535_v16 = vmax.f32 %v2527_v37, 0.0 }
 0xfdc   :  { %v2530_v50 = vpop.f32.mrf.mxu0 }
 0xfdd   :  { %v2531_v48 = vadd.f32 %v2530_v50, %v2405_v10  ;;  %v2536_v14 = vmax.f32 %v2529_v35, 0.0 }
 0xfde   :  { %v2532_v45 = vpop.f32.mrf.mxu0 }
 0xfdf   :  { %v2533_v51 = vadd.f32 %v2532_v45, %v2409_v41  ;;  %v2537_v12 = vmax.f32 %v2531_v48, 0.0 }
 0xfe1   :  { %v2538_v15 = vmax.f32 %v2533_v51, 0.0  ;;  %v2539_v46 = vpack.c.bf16 %v2537_v12, %v2535_v16 }
 0xfe3   :  { %v2540_v24 = vpack.c.bf16 %v2538_v15, %v2536_v14 }
 0xfe5   :  { %2979 = vmatprep.mubr.bf16.mxu1 %v2540_v24  ;;  %3022 = vmatprep.mubr.bf16.mxu0 %v2540_v24 }
 0xfe6   :  { %2980 = vmatmul.mubr.bf16.vlgmr.msra.gmra.mxu1 %v2539_v46  ;;  %3023 = vmatmul.mubr.bf16.vlgmr.msra.gmra.mxu0 %v2539_v46 }
 0xfe7   :  { %3749 = vmatpush3.bf16.msra.mxu1 %v4260_v25  ;;  %3771 = vmatpush3.bf16.msra.mxu0 %v4261_v26 }
 0xfe8   :  { %3750 = vmatprep.subr.bf16.mxu1 %v4262_v27  ;;  %3772 = vmatprep.subr.bf16.mxu0 %v4263_v28  ;;  %v3640_v28 = vld [vmem:[#allocation13 + $0x13] ss:$0 sm:$0xff] }
 0xfeb   :  { %3751 = vmatpush3.bf16.msra.mxu1 %v4264_v42  ;;  %3773 = vmatpush3.bf16.msra.mxu0 %v4265_v29 }
 0xfec   :  { %3752 = vmatprep.subr.bf16.mxu1 %v4266_v11  ;;  %3774 = vmatprep.subr.bf16.mxu0 %v4267_v30  ;;  %v3427_v30 = vld [vmem:[#allocation13 + $0x14] ss:$0 sm:$0xff] }
 0xfef   :  { %3753 = vmatpush3.bf16.msra.mxu1 %v4268_v18  ;;  %3775 = vmatpush3.bf16.msra.mxu0 %v4269_v31 }
 0xff0   :  { %3754 = vmatprep.subr.bf16.mxu1 %v4270_v32  ;;  %3776 = vmatprep.subr.bf16.mxu0 %v4271_v0 }
 0xff3   :  { %3755 = vmatpush3.bf16.msra.mxu1 %v4272_v33  ;;  %3777 = vmatpush3.bf16.msra.mxu0 %v4273_v36 }
 0xff4   :  { %3756 = vmatprep.subr.bf16.mxu1 %v4274_v38  ;;  %3778 = vmatprep.subr.bf16.mxu0 %v4275_v39  ;;  %v373_v38 = vadd.f32 %v3427_v30, %v4633_v47 }
 0xff7   :  { %3757 = vmatpush3.bf16.msra.mxu1 %v4276_v40  ;;  %3779 = vmatpush3.bf16.msra.mxu0 %v4277_v43 }
 0xff8   :  { %3758 = vmatprep.subr.bf16.mxu1 %v4278_v44  ;;  %3780 = vmatprep.subr.bf16.mxu0 %v4279_v49 }
 0xffb   :  { %3759 = vmatpush3.bf16.msra.mxu1 %v4280_v52  ;;  %3781 = vmatpush3.bf16.msra.mxu0 %v4281_v53  ;;  %v374_v52 = vadd.f32 %v3427_v30, %v4638_v60 }
 0xffc   :  { %3760 = vmatprep.subr.bf16.mxu1 %v4282_v54  ;;  %3782 = vmatprep.subr.bf16.mxu0 %v4283_v55 }
 0xfff   :  { %3761 = vmatpush3.bf16.msra.mxu1 %v4284_v56  ;;  %3783 = vmatpush3.bf16.msra.mxu0 %v4285_v57 }
0x1000   :  { %3762 = vmatprep.subr.bf16.mxu1 %v4286_v58  ;;  %3784 = vmatprep.subr.bf16.mxu0 %v4287_v59 }
0x1003   :  { %3763 = vmatpush3.bf16.msra.mxu1 %v4288_v13  ;;  %3785 = vmatpush3.bf16.msra.mxu0 %v4289_v61 }
0x10a6   :  { %v2981_v63 = vpop.f32.mrf.mxu1  ;;  %v3024_v1 = vpop.f32.mrf.mxu0 }
0x10a7   :  { %v2982_v50 = vadd.f32 %v2981_v63, %v2610_v4  ;;  %v3025_v35 = vadd.f32 %v3024_v1, %v2618_v5 }
0x10a8   :  { %v2983_v6 = vpop.f32.mrf.mxu1  ;;  %v3026_v7 = vpop.f32.mrf.mxu0 }
0x10a9   :  { %v2984_v34 = vadd.f32 %v2983_v6, %v2614_v2  ;;  %v3027_v41 = vadd.f32 %v3026_v7, %v2622_v3  ;;  %v3033_v14 = vmax.f32 %v2982_v50, 0.0  ;;  %v3035_v15 = vmax.f32 %v3025_v35, 0.0 }
0x10aa   :  { %v2985_v8 = vpop.f32.mrf.mxu1  ;;  %v3028_v9 = vpop.f32.mrf.mxu0 }
0x10ab   :  { %v2986_v10 = vadd.f32 %v2985_v8, %v2610_v4  ;;  %v3029_v17 = vadd.f32 %v3028_v9, %v2618_v5  ;;  %v3034_v51 = vmax.f32 %v2984_v34, 0.0  ;;  %v3036_v22 = vmax.f32 %v3027_v41, 0.0 }
0x10ac   :  { %v2987_v48 = vpop.f32.mrf.mxu1  ;;  %v3030_v37 = vpop.f32.mrf.mxu0 }
0x10ad   :  { %v2988_v20 = vadd.f32 %v2987_v48, %v2614_v2  ;;  %v3031_v45 = vadd.f32 %v3030_v37, %v2622_v3  ;;  %v3037_v19 = vmax.f32 %v2986_v10, 0.0  ;;  %v3039_v21 = vmax.f32 %v3029_v17, 0.0 }
0x10af   :  { %v3038_v12 = vmax.f32 %v2988_v20, 0.0  ;;  %v3040_v23 = vmax.f32 %v3031_v45, 0.0  ;;  %v3041_v25 = vpack.c.bf16 %v3037_v19, %v3033_v14  ;;  %v3043_v26 = vpack.c.bf16 %v3039_v21, %v3035_v15 }
0x10b1   :  { %v3042_v16 = vpack.c.bf16 %v3038_v12, %v3034_v51  ;;  %v3044_v24 = vpack.c.bf16 %v3040_v23, %v3036_v22 }
0x10b3   :  { %3340 = vmatprep.mubr.bf16.mxu1 %v3042_v16  ;;  %3381 = vmatprep.mubr.bf16.mxu0 %v3044_v24 }
0x10b4   :  { %3341 = vmatmul.mubr.bf16.vlgmr.msra.gmra.mxu1 %v3041_v25  ;;  %3382 = vmatmul.mubr.bf16.vlgmr.msra.gmra.mxu0 %v3043_v26 }
0x1174   :  { %v3764_v46 = vpop.f32.mrf.mxu1  ;;  %v3786_v27 = vpop.f32.mrf.mxu0 }
0x1176   :  { %v3765_v42 = vpop.f32.mrf.mxu1  ;;  %v3787_v29 = vpop.f32.mrf.mxu0 }
0x1177   :  { %v3766_v11 = vadd.f32 %v3765_v42, %v3764_v46  ;;  %v3788_v0 = vadd.f32 %v3787_v29, %v3786_v27 }
0x1178   :  { %v3767_v18 = vpop.f32.mrf.mxu1  ;;  %v3789_v31 = vpop.f32.mrf.mxu0 }
0x1179   :  { %v3343_v32 = vadd.f32 %v3766_v11, %v3640_v28 }
0x117a   :  { %v3768_v33 = vpop.f32.mrf.mxu1  ;;  %v3790_v36 = vpop.f32.mrf.mxu0 }
0x117b   :  { %v3384_v39 = vadd.f32 %v3788_v0, %v3343_v32  ;;  %v3769_v40 = vadd.f32 %v3768_v33, %v3767_v18  ;;  %v3791_v49 = vadd.f32 %v3790_v36, %v3789_v31 }
0x117d   :  { %v3390_v43 = vadd.f32 %v3384_v39, %v373_v38  ;;  %v3346_v44 = vadd.f32 %v3769_v40, %v3640_v28 }
0x117f   :  { %3392 = vst.msk [vmem:[#allocation14] sm:$0xff] %vm197_vm0, %v3390_v43  ;;  %v3387_v53 = vadd.f32 %v3791_v49, %v3346_v44 }
0x1181   :  { %v3391_v54 = vadd.f32 %v3387_v53, %v374_v52 }
0x1183   :  { %3393 = vst.msk [vmem:[#allocation14 + $0x8] sm:$0xff] %vm197_vm0, %v3391_v54 }
0x1184   :  { %4477 = shalt.err (!%p4474_p11)
}
0x1185   :  { %3405 = dma.vmem_to_hbm [thread:$0]  %s3400_s0, 256, %s5096_s10, [#allocation4], %s4506_s15, %s4506_s15, %s4507_s16  }
0x1186   :  { %4494 = dma.done.wait [#allocation4], 256  }
0x1187   :  { %4495 = vsyncadd [#allocation4], 4294967040 }
0x1188   :  { %3409 = vsyncpa [#allocation3], 1 }
0x1189   :  { %3410 = vsyncpa [#allocation6], 1 }
0x118a   :  { %3411 = vsyncpa [#allocation9], 1 }
0x118b   :  { %3412 = vsyncpa [#allocation12], 1 }
0x118c   :  { %3413 = vsyncpa [#allocation4], 1 }

</bundles_post_ra>
